<compile_context>
chip_gen: v7x
topology: tpu7x:2x2x1
jax: 0.10.0
libtpu: 0.0.40
codegen_flags: <defaults>
</compile_context>

<pallas_src>
import functools

import jax
import jax.numpy as jnp
from jax.experimental import pallas as pl
from jax.experimental.pallas import tpu as pltpu


def _get_loss_kernel(pred_ref, tgt_ref, trans_ref, out_ref,
                     nll_acc, fro_acc, *, scale, batch):
    pid = pl.program_id(0)
    tile_b, c = pred_ref.shape
    k = trans_ref.shape[1]

    @pl.when(pid == 0)
    def _init():
        nll_acc[...] = jnp.zeros_like(nll_acc)
        fro_acc[...] = jnp.zeros_like(fro_acc)

    pred = pred_ref[...].astype(jnp.float32)       # (TB, C) - small, f32 for the sum
    tgt = tgt_ref[...]                             # (TB, 1) int32
    trans = trans_ref[...]                         # (TB, K, K) native dtype (bf16/f32)

    # ---- row validity mask (handles last partial batch tile) ----
    row = jax.lax.broadcasted_iota(jnp.int32, (tile_b, 1), 0) + pid * tile_b
    valid = row < batch                            # (TB, 1) bool

    # ---- NLL per-row partial: -pred[b, target[b]] ----
    col = jax.lax.broadcasted_iota(jnp.int32, (tile_b, c), 1)
    cls_mask = (col == tgt) & valid                                   # (TB, C) bool
    nll_rows = -jnp.sum(jnp.where(cls_mask, pred, 0.0),
                        axis=1, keepdims=True)                        # (TB, 1)

    # ---- feature_transform_reguliarzer per-row partial ----
    # sq[b] = || trans[b] @ trans[b]^T - I ||_F^2, computed directly from (G - I).
    if k <= 16:
        # VPU path: per-batch matmul is tiny vs. the MXU array; unroll over Gram rows.
        t32 = trans.astype(jnp.float32)                               # small tile
        lane_j = jax.lax.broadcasted_iota(jnp.int32, (tile_b, k), 1)
        sq = jnp.zeros((tile_b, 1), jnp.float32)
        for i in range(k):                                            # static unroll
            row_i = t32[:, i:i + 1, :]                                # (TB, 1, K)
            g_i = jnp.sum(row_i * t32, axis=2)                        # (TB, K) Gram row i
            d_i = g_i - jnp.where(lane_j == i, 1.0, 0.0)              # subtract I row i
            sq = sq + jnp.sum(d_i * d_i, axis=1, keepdims=True)       # (TB, 1)
    else:
        # MXU path: batched Gram on native-dtype operands, f32 accumulation.
        gram = jax.lax.dot_general(
            trans, trans,
            dimension_numbers=(((2,), (2,)), ((0,), (0,))),
            preferred_element_type=jnp.float32)                       # (TB, K, K) f32
        ii = jax.lax.broadcasted_iota(jnp.int32, (k, k), 0)
        jj = jax.lax.broadcasted_iota(jnp.int32, (k, k), 1)
        d = gram - jnp.where(ii == jj, 1.0, 0.0)                      # G - I
        sq = jnp.sum(jnp.sum(d * d, axis=2), axis=1, keepdims=True)   # (TB, 1)

    fro = jnp.sqrt(sq)                          # sq >= 0 by construction (no clamp)
    fro = jnp.where(valid, fro, 0.0)            # select blocks NaN/garbage rows

    nll_acc[...] += nll_rows
    fro_acc[...] += fro

    @pl.when(pid == pl.num_programs(0) - 1)
    def _finalize():
        combined = (nll_acc[...] * jnp.float32(1.0 / batch)
                    + fro_acc[...] * jnp.float32(scale / batch))
        out_ref[...] = jnp.sum(combined, axis=0, keepdims=True)       # (1, 1)


def _round_up(x, m):
    return -(-x // m) * m


def _vmem_budget_bytes():
    """(tile budget, vmem_limit_bytes) per TPU generation."""
    kind = ""
    try:
        kind = jax.devices()[0].device_kind.lower()
    except Exception:
        pass
    mib = 1024 * 1024
    if "v7" in kind:            # 64 MiB physical per TensorCore
        return 36 * mib, 48 * mib
    if "v6" in kind:            # 128 MiB physical
        return 48 * mib, 64 * mib
    if "v5" in kind:            # 128 MiB physical, 16 MiB default scoped limit
        return 32 * mib, 48 * mib
    return 28 * mib, 48 * mib   # unknown: conservative


def _pick_tile_b(B, C, K, pred_dtype, trans_dtype, budget):
    """Batch-tile size from lane-padded per-row bytes incl. double buffering + temps."""
    lane = 128
    pred_row = _round_up(C, lane) * jnp.dtype(pred_dtype).itemsize
    tgt_row = lane * 4
    trans_row = _round_up(K, 8) * _round_up(K, lane) * jnp.dtype(trans_dtype).itemsize
    if K <= 16:
        # f32 copy + live broadcast product + gram-row temps (all lane-padded)
        temps_row = 3 * _round_up(K, 8) * lane * 4
    else:
        # f32 gram + (G - I) + squared temp
        temps_row = 3 * _round_up(K, 8) * _round_up(K, lane) * 4
    per_row = 2 * (pred_row + tgt_row + trans_row) + temps_row + 2 * 4
    tile_b = budget // per_row
    tile_b = max(16, (tile_b // 16) * 16)   # multiple of 16 (bf16 sublane packing)
    tile_b = min(tile_b, 1024)              # per-step overhead amortized well before this
    if tile_b >= B:
        tile_b = B
    return int(tile_b)


def get_loss(pred, target, trans_feat, mat_diff_loss_scale=0.001, *, tile_b=None):
    """JAX/Pallas equivalent of pointnet_reg.get_loss.forward."""
    B, C = pred.shape
    K = trans_feat.shape[1]
    tgt2d = target.astype(jnp.int32).reshape(B, 1)

    budget, vmem_limit = _vmem_budget_bytes()
    if tile_b is None:
        tile_b = _pick_tile_b(B, C, K, pred.dtype, trans_feat.dtype, budget)
    tile_b = min(tile_b, B)
    grid = (pl.cdiv(B, tile_b),)

    kernel = functools.partial(
        _get_loss_kernel,
        scale=float(mat_diff_loss_scale),
        batch=B,
    )

    out = pl.pallas_call(
        kernel,
        out_shape=jax.ShapeDtypeStruct((1, 1), jnp.float32),
        grid=grid,
        in_specs=[
            pl.BlockSpec((tile_b, C), lambda i: (i, 0)),
            pl.BlockSpec((tile_b, 1), lambda i: (i, 0)),
            pl.BlockSpec((tile_b, K, K), lambda i: (i, 0, 0)),
        ],
        out_specs=pl.BlockSpec((1, 1), lambda i: (0, 0)),
        scratch_shapes=[
            pltpu.VMEM((tile_b, 1), jnp.float32),
            pltpu.VMEM((tile_b, 1), jnp.float32),
        ],
        compiler_params=pltpu.CompilerParams(
            dimension_semantics=("arbitrary",),
            vmem_limit_bytes=int(vmem_limit),
        ),
    )(pred, tgt2d, trans_feat)
    return out[0, 0]


def _reference(pred, target, trans_feat, scale=0.001):
    # Pure-JAX reference (matches torch semantics).
    B, C = pred.shape
    pred = pred.astype(jnp.float32)
    trans_feat = trans_feat.astype(jnp.float32)
    nll = -jnp.mean(pred[jnp.arange(B), target])
    K = trans_feat.shape[1]
    eye = jnp.eye(K, dtype=jnp.float32)
    gram = jnp.einsum("bik,bjk->bij", trans_feat, trans_feat)
    fro = jnp.sqrt(jnp.sum((gram - eye[None]) ** 2, axis=(1, 2)))
    return nll + jnp.mean(fro) * scale


if __name__ == "__main__":
    key = jax.random.PRNGKey(0)
    k1, k2, k3 = jax.random.split(key, 3)

    # Case 1: small K (VPU Gram path), single tile — shapes consistent with the module.
    B, C, K = 8, 10, 8
    logits = jax.random.normal(k1, (B, C), dtype=jnp.float32)
    pred = jax.nn.log_softmax(logits, axis=-1)           # log-probs, as nll_loss expects
    target = jax.random.randint(k2, (B,), 0, C, dtype=jnp.int32)
    trans_feat = jax.random.normal(k3, (B, K, K), dtype=jnp.float32) * 0.1

    out = jax.block_until_ready(get_loss(pred, target, trans_feat))
    ref = _reference(pred, target, trans_feat)
    if not jnp.allclose(out, ref, atol=1e-5, rtol=1e-5):
        raise AssertionError(f"case1 mismatch: kernel={out} ref={ref}")

    # Case 2: multi-tile grid with a partial last tile (exercises masking/accumulation).
    B2 = 40
    k4, k5, k6 = jax.random.split(jax.random.PRNGKey(1), 3)
    pred2 = jax.nn.log_softmax(jax.random.normal(k4, (B2, C), dtype=jnp.float32), axis=-1)
    tgt2 = jax.random.randint(k5, (B2,), 0, C, dtype=jnp.int32)
    tf2 = jax.random.normal(k6, (B2, K, K), dtype=jnp.float32) * 0.1
    out2 = jax.block_until_ready(get_loss(pred2, tgt2, tf2, tile_b=16))
    ref2 = _reference(pred2, tgt2, tf2)
    if not jnp.allclose(out2, ref2, atol=1e-5, rtol=1e-5):
        raise AssertionError(f"case2 mismatch: kernel={out2} ref={ref2}")

    # Case 3: large K with bf16 trans (MXU path, native-dtype operands, f32 accumulation).
    B3, K3 = 4, 64
    k7, k8, k9 = jax.random.split(jax.random.PRNGKey(2), 3)
    pred3 = jax.nn.log_softmax(jax.random.normal(k7, (B3, C), dtype=jnp.float32), axis=-1)
    tgt3 = jax.random.randint(k8, (B3,), 0, C, dtype=jnp.int32)
    tf3 = (jax.random.normal(k9, (B3, K3, K3), dtype=jnp.float32) * 0.05).astype(jnp.bfloat16)
    out3 = jax.block_until_ready(get_loss(pred3, tgt3, tf3))
    ref3 = _reference(pred3, tgt3, tf3)
    if not jnp.allclose(out3, ref3, atol=5e-4, rtol=5e-4):
        raise AssertionError(f"case3 mismatch: kernel={out3} ref={ref3}")

    print("KERNEL_OK")
</pallas_src>

<mosaic_0001>
module attributes {stable_mosaic.version = 11 : i64} {
  func.func @_get_loss_kernel(%arg0: i32, %arg1: memref<8x10xf32, #tpu.memory_space<vmem>>, %arg2: memref<8x1xi32, #tpu.memory_space<vmem>>, %arg3: memref<8x8x8xf32, #tpu.memory_space<vmem>>, %arg4: memref<1x1xf32, #tpu.memory_space<vmem>>, %arg5: memref<8x1xf32, #tpu.memory_space<vmem>>, %arg6: memref<8x1xf32, #tpu.memory_space<vmem>>) attributes {dimension_semantics = [#tpu.dimension_semantics<arbitrary>], iteration_bounds = array<i64: 1>, scalar_prefetch = 0 : i64, scratch_operands = 2 : i64, tpu.core_type = #tpu.core_type<tc>, window_params = [{transform_indices = @transform_0, window_bounds = array<i64: 8, 10>}, {transform_indices = @transform_1, window_bounds = array<i64: 8, 1>}, {transform_indices = @transform_2, window_bounds = array<i64: 8, 8, 8>}, {pipeline_mode = #tpu.pipeline_mode<synchronous>, transform_indices = @transform_3, window_bounds = array<i64: 1, 1>}]} {
    %c0_i32 = arith.constant 0 : i32
    %0 = arith.cmpi eq, %arg0, %c0_i32 : i32
    %1 = arith.extui %0 : i1 to i32
    %c0_i32_0 = arith.constant 0 : i32
    %2 = arith.cmpi ne, %1, %c0_i32_0 : i32
    scf.if %2 {
      %cst_55 = arith.constant 0.000000e+00 : f32
      %149 = vector.broadcast %cst_55 : f32 to vector<8x1xf32>
      %c0_56 = arith.constant 0 : index
      %c0_57 = arith.constant 0 : index
      %150 = vector.load %arg5[%c0_56, %c0_57] : memref<8x1xf32, #tpu.memory_space<vmem>>, vector<8x1xf32>
      tpu.vector_store %arg5[%c0_56, %c0_57], %149 {strides = array<i32>} : memref<8x1xf32, #tpu.memory_space<vmem>>, vector<8x1xf32>,
      %cst_58 = arith.constant 0.000000e+00 : f32
      %151 = vector.broadcast %cst_58 : f32 to vector<8x1xf32>
      %c0_59 = arith.constant 0 : index
      %c0_60 = arith.constant 0 : index
      %152 = vector.load %arg6[%c0_59, %c0_60] : memref<8x1xf32, #tpu.memory_space<vmem>>, vector<8x1xf32>
      tpu.vector_store %arg6[%c0_59, %c0_60], %151 {strides = array<i32>} : memref<8x1xf32, #tpu.memory_space<vmem>>, vector<8x1xf32>,
    } else {
    }
    %c0 = arith.constant 0 : index
    %c0_1 = arith.constant 0 : index
    %3 = vector.load %arg1[%c0, %c0_1] : memref<8x10xf32, #tpu.memory_space<vmem>>, vector<8x10xf32>
    %c0_2 = arith.constant 0 : index
    %c0_3 = arith.constant 0 : index
    %4 = vector.load %arg2[%c0_2, %c0_3] : memref<8x1xi32, #tpu.memory_space<vmem>>, vector<8x1xi32>
    %c0_4 = arith.constant 0 : index
    %c0_5 = arith.constant 0 : index
    %c0_6 = arith.constant 0 : index
    %5 = vector.load %arg3[%c0_4, %c0_5, %c0_6] : memref<8x8x8xf32, #tpu.memory_space<vmem>>, vector<8x8x8xf32>
    %6 = tpu.iota {dimensions = array<i32: 0>} : vector<8x1xi32>
    %c8_i32 = arith.constant 8 : i32
    %7 = arith.muli %arg0, %c8_i32 : i32
    %8 = vector.broadcast %7 : i32 to vector<8x1xi32>
    %9 = arith.addi %6, %8 : vector<8x1xi32>
    %c8_i32_7 = arith.constant 8 : i32
    %10 = vector.broadcast %c8_i32_7 : i32 to vector<8x1xi32>
    %11 = arith.cmpi slt, %9, %10 : vector<8x1xi32>
    %12 = tpu.iota {dimensions = array<i32: 1>} : vector<8x10xi32>
    %13 = vector.broadcast %4 : vector<8x1xi32> to vector<8x10xi32>
    %14 = arith.cmpi eq, %12, %13 : vector<8x10xi32>
    %15 = vector.broadcast %11 : vector<8x1xi1> to vector<8x10xi1>
    %16 = arith.andi %14, %15 : vector<8x10xi1>
    %cst = arith.constant 0.000000e+00 : f32
    %17 = vector.broadcast %cst : f32 to vector<8x10xf32>
    %18 = arith.select %16, %3, %17 : vector<8x10xi1>, vector<8x10xf32>
    %cst_8 = arith.constant dense<0.000000e+00> : vector<8xf32>
    %19 = vector.multi_reduction <add>, %18, %cst_8 [1] : vector<8x10xf32> to vector<8xf32>
    %20 = vector.shape_cast %19 : vector<8xf32> to vector<8x1xf32>
    %cst_9 = arith.constant 0.000000e+00 : f32
    %21 = vector.broadcast %cst_9 : f32 to vector<8x1xf32>
    %22 = arith.subf %21, %20 : vector<8x1xf32>
    %23 = tpu.iota {dimensions = array<i32: 1>} : vector<8x8xi32>
    %cst_10 = arith.constant 0.000000e+00 : f32
    %24 = vector.broadcast %cst_10 : f32 to vector<8x1xf32>
    %25 = vector.extract_strided_slice %5 {offsets = [0, 0, 0], sizes = [8, 1, 8], strides = [1, 1, 1]} : vector<8x8x8xf32> to vector<8x1x8xf32>
    %26 = vector.broadcast %25 : vector<8x1x8xf32> to vector<8x8x8xf32>
    %27 = arith.mulf %26, %5 : vector<8x8x8xf32>
    %cst_11 = arith.constant dense<0.000000e+00> : vector<8x8xf32>
    %28 = vector.multi_reduction <add>, %27, %cst_11 [2] : vector<8x8x8xf32> to vector<8x8xf32>
    %c0_i32_12 = arith.constant 0 : i32
    %29 = vector.broadcast %c0_i32_12 : i32 to vector<8x8xi32>
    %30 = arith.cmpi eq, %23, %29 : vector<8x8xi32>
    %cst_13 = arith.constant 1.000000e+00 : f32
    %cst_14 = arith.constant 0.000000e+00 : f32
    %31 = vector.broadcast %cst_13 : f32 to vector<8x8xf32>
    %32 = vector.broadcast %cst_14 : f32 to vector<8x8xf32>
    %33 = arith.select %30, %31, %32 : vector<8x8xi1>, vector<8x8xf32>
    %34 = arith.subf %28, %33 : vector<8x8xf32>
    %35 = arith.mulf %34, %34 : vector<8x8xf32>
    %cst_15 = arith.constant dense<0.000000e+00> : vector<8xf32>
    %36 = vector.multi_reduction <add>, %35, %cst_15 [1] : vector<8x8xf32> to vector<8xf32>
    %37 = vector.shape_cast %36 : vector<8xf32> to vector<8x1xf32>
    %38 = arith.addf %24, %37 : vector<8x1xf32>
    %39 = vector.extract_strided_slice %5 {offsets = [0, 1, 0], sizes = [8, 1, 8], strides = [1, 1, 1]} : vector<8x8x8xf32> to vector<8x1x8xf32>
    %40 = vector.broadcast %39 : vector<8x1x8xf32> to vector<8x8x8xf32>
    %41 = arith.mulf %40, %5 : vector<8x8x8xf32>
    %cst_16 = arith.constant dense<0.000000e+00> : vector<8x8xf32>
    %42 = vector.multi_reduction <add>, %41, %cst_16 [2] : vector<8x8x8xf32> to vector<8x8xf32>
    %c1_i32 = arith.constant 1 : i32
    %43 = vector.broadcast %c1_i32 : i32 to vector<8x8xi32>
    %44 = arith.cmpi eq, %23, %43 : vector<8x8xi32>
    %cst_17 = arith.constant 1.000000e+00 : f32
    %cst_18 = arith.constant 0.000000e+00 : f32
    %45 = vector.broadcast %cst_17 : f32 to vector<8x8xf32>
    %46 = vector.broadcast %cst_18 : f32 to vector<8x8xf32>
    %47 = arith.select %44, %45, %46 : vector<8x8xi1>, vector<8x8xf32>
    %48 = arith.subf %42, %47 : vector<8x8xf32>
    %49 = arith.mulf %48, %48 : vector<8x8xf32>
    %cst_19 = arith.constant dense<0.000000e+00> : vector<8xf32>
    %50 = vector.multi_reduction <add>, %49, %cst_19 [1] : vector<8x8xf32> to vector<8xf32>
    %51 = vector.shape_cast %50 : vector<8xf32> to vector<8x1xf32>
    %52 = arith.addf %38, %51 : vector<8x1xf32>
    %53 = vector.extract_strided_slice %5 {offsets = [0, 2, 0], sizes = [8, 1, 8], strides = [1, 1, 1]} : vector<8x8x8xf32> to vector<8x1x8xf32>
    %54 = vector.broadcast %53 : vector<8x1x8xf32> to vector<8x8x8xf32>
    %55 = arith.mulf %54, %5 : vector<8x8x8xf32>
    %cst_20 = arith.constant dense<0.000000e+00> : vector<8x8xf32>
    %56 = vector.multi_reduction <add>, %55, %cst_20 [2] : vector<8x8x8xf32> to vector<8x8xf32>
    %c2_i32 = arith.constant 2 : i32
    %57 = vector.broadcast %c2_i32 : i32 to vector<8x8xi32>
    %58 = arith.cmpi eq, %23, %57 : vector<8x8xi32>
    %cst_21 = arith.constant 1.000000e+00 : f32
    %cst_22 = arith.constant 0.000000e+00 : f32
    %59 = vector.broadcast %cst_21 : f32 to vector<8x8xf32>
    %60 = vector.broadcast %cst_22 : f32 to vector<8x8xf32>
    %61 = arith.select %58, %59, %60 : vector<8x8xi1>, vector<8x8xf32>
    %62 = arith.subf %56, %61 : vector<8x8xf32>
    %63 = arith.mulf %62, %62 : vector<8x8xf32>
    %cst_23 = arith.constant dense<0.000000e+00> : vector<8xf32>
    %64 = vector.multi_reduction <add>, %63, %cst_23 [1] : vector<8x8xf32> to vector<8xf32>
    %65 = vector.shape_cast %64 : vector<8xf32> to vector<8x1xf32>
    %66 = arith.addf %52, %65 : vector<8x1xf32>
    %67 = vector.extract_strided_slice %5 {offsets = [0, 3, 0], sizes = [8, 1, 8], strides = [1, 1, 1]} : vector<8x8x8xf32> to vector<8x1x8xf32>
    %68 = vector.broadcast %67 : vector<8x1x8xf32> to vector<8x8x8xf32>
    %69 = arith.mulf %68, %5 : vector<8x8x8xf32>
    %cst_24 = arith.constant dense<0.000000e+00> : vector<8x8xf32>
    %70 = vector.multi_reduction <add>, %69, %cst_24 [2] : vector<8x8x8xf32> to vector<8x8xf32>
    %c3_i32 = arith.constant 3 : i32
    %71 = vector.broadcast %c3_i32 : i32 to vector<8x8xi32>
    %72 = arith.cmpi eq, %23, %71 : vector<8x8xi32>
    %cst_25 = arith.constant 1.000000e+00 : f32
    %cst_26 = arith.constant 0.000000e+00 : f32
    %73 = vector.broadcast %cst_25 : f32 to vector<8x8xf32>
    %74 = vector.broadcast %cst_26 : f32 to vector<8x8xf32>
    %75 = arith.select %72, %73, %74 : vector<8x8xi1>, vector<8x8xf32>
    %76 = arith.subf %70, %75 : vector<8x8xf32>
    %77 = arith.mulf %76, %76 : vector<8x8xf32>
    %cst_27 = arith.constant dense<0.000000e+00> : vector<8xf32>
    %78 = vector.multi_reduction <add>, %77, %cst_27 [1] : vector<8x8xf32> to vector<8xf32>
    %79 = vector.shape_cast %78 : vector<8xf32> to vector<8x1xf32>
    %80 = arith.addf %66, %79 : vector<8x1xf32>
    %81 = vector.extract_strided_slice %5 {offsets = [0, 4, 0], sizes = [8, 1, 8], strides = [1, 1, 1]} : vector<8x8x8xf32> to vector<8x1x8xf32>
    %82 = vector.broadcast %81 : vector<8x1x8xf32> to vector<8x8x8xf32>
    %83 = arith.mulf %82, %5 : vector<8x8x8xf32>
    %cst_28 = arith.constant dense<0.000000e+00> : vector<8x8xf32>
    %84 = vector.multi_reduction <add>, %83, %cst_28 [2] : vector<8x8x8xf32> to vector<8x8xf32>
    %c4_i32 = arith.constant 4 : i32
    %85 = vector.broadcast %c4_i32 : i32 to vector<8x8xi32>
    %86 = arith.cmpi eq, %23, %85 : vector<8x8xi32>
    %cst_29 = arith.constant 1.000000e+00 : f32
    %cst_30 = arith.constant 0.000000e+00 : f32
    %87 = vector.broadcast %cst_29 : f32 to vector<8x8xf32>
    %88 = vector.broadcast %cst_30 : f32 to vector<8x8xf32>
    %89 = arith.select %86, %87, %88 : vector<8x8xi1>, vector<8x8xf32>
    %90 = arith.subf %84, %89 : vector<8x8xf32>
    %91 = arith.mulf %90, %90 : vector<8x8xf32>
    %cst_31 = arith.constant dense<0.000000e+00> : vector<8xf32>
    %92 = vector.multi_reduction <add>, %91, %cst_31 [1] : vector<8x8xf32> to vector<8xf32>
    %93 = vector.shape_cast %92 : vector<8xf32> to vector<8x1xf32>
    %94 = arith.addf %80, %93 : vector<8x1xf32>
    %95 = vector.extract_strided_slice %5 {offsets = [0, 5, 0], sizes = [8, 1, 8], strides = [1, 1, 1]} : vector<8x8x8xf32> to vector<8x1x8xf32>
    %96 = vector.broadcast %95 : vector<8x1x8xf32> to vector<8x8x8xf32>
    %97 = arith.mulf %96, %5 : vector<8x8x8xf32>
    %cst_32 = arith.constant dense<0.000000e+00> : vector<8x8xf32>
    %98 = vector.multi_reduction <add>, %97, %cst_32 [2] : vector<8x8x8xf32> to vector<8x8xf32>
    %c5_i32 = arith.constant 5 : i32
    %99 = vector.broadcast %c5_i32 : i32 to vector<8x8xi32>
    %100 = arith.cmpi eq, %23, %99 : vector<8x8xi32>
    %cst_33 = arith.constant 1.000000e+00 : f32
    %cst_34 = arith.constant 0.000000e+00 : f32
    %101 = vector.broadcast %cst_33 : f32 to vector<8x8xf32>
    %102 = vector.broadcast %cst_34 : f32 to vector<8x8xf32>
    %103 = arith.select %100, %101, %102 : vector<8x8xi1>, vector<8x8xf32>
    %104 = arith.subf %98, %103 : vector<8x8xf32>
    %105 = arith.mulf %104, %104 : vector<8x8xf32>
    %cst_35 = arith.constant dense<0.000000e+00> : vector<8xf32>
    %106 = vector.multi_reduction <add>, %105, %cst_35 [1] : vector<8x8xf32> to vector<8xf32>
    %107 = vector.shape_cast %106 : vector<8xf32> to vector<8x1xf32>
    %108 = arith.addf %94, %107 : vector<8x1xf32>
    %109 = vector.extract_strided_slice %5 {offsets = [0, 6, 0], sizes = [8, 1, 8], strides = [1, 1, 1]} : vector<8x8x8xf32> to vector<8x1x8xf32>
    %110 = vector.broadcast %109 : vector<8x1x8xf32> to vector<8x8x8xf32>
    %111 = arith.mulf %110, %5 : vector<8x8x8xf32>
    %cst_36 = arith.constant dense<0.000000e+00> : vector<8x8xf32>
    %112 = vector.multi_reduction <add>, %111, %cst_36 [2] : vector<8x8x8xf32> to vector<8x8xf32>
    %c6_i32 = arith.constant 6 : i32
    %113 = vector.broadcast %c6_i32 : i32 to vector<8x8xi32>
    %114 = arith.cmpi eq, %23, %113 : vector<8x8xi32>
    %cst_37 = arith.constant 1.000000e+00 : f32
    %cst_38 = arith.constant 0.000000e+00 : f32
    %115 = vector.broadcast %cst_37 : f32 to vector<8x8xf32>
    %116 = vector.broadcast %cst_38 : f32 to vector<8x8xf32>
    %117 = arith.select %114, %115, %116 : vector<8x8xi1>, vector<8x8xf32>
    %118 = arith.subf %112, %117 : vector<8x8xf32>
    %119 = arith.mulf %118, %118 : vector<8x8xf32>
    %cst_39 = arith.constant dense<0.000000e+00> : vector<8xf32>
    %120 = vector.multi_reduction <add>, %119, %cst_39 [1] : vector<8x8xf32> to vector<8xf32>
    %121 = vector.shape_cast %120 : vector<8xf32> to vector<8x1xf32>
    %122 = arith.addf %108, %121 : vector<8x1xf32>
    %123 = vector.extract_strided_slice %5 {offsets = [0, 7, 0], sizes = [8, 1, 8], strides = [1, 1, 1]} : vector<8x8x8xf32> to vector<8x1x8xf32>
    %124 = vector.broadcast %123 : vector<8x1x8xf32> to vector<8x8x8xf32>
    %125 = arith.mulf %124, %5 : vector<8x8x8xf32>
    %cst_40 = arith.constant dense<0.000000e+00> : vector<8x8xf32>
    %126 = vector.multi_reduction <add>, %125, %cst_40 [2] : vector<8x8x8xf32> to vector<8x8xf32>
    %c7_i32 = arith.constant 7 : i32
    %127 = vector.broadcast %c7_i32 : i32 to vector<8x8xi32>
    %128 = arith.cmpi eq, %23, %127 : vector<8x8xi32>
    %cst_41 = arith.constant 1.000000e+00 : f32
    %cst_42 = arith.constant 0.000000e+00 : f32
    %129 = vector.broadcast %cst_41 : f32 to vector<8x8xf32>
    %130 = vector.broadcast %cst_42 : f32 to vector<8x8xf32>
    %131 = arith.select %128, %129, %130 : vector<8x8xi1>, vector<8x8xf32>
    %132 = arith.subf %126, %131 : vector<8x8xf32>
    %133 = arith.mulf %132, %132 : vector<8x8xf32>
    %cst_43 = arith.constant dense<0.000000e+00> : vector<8xf32>
    %134 = vector.multi_reduction <add>, %133, %cst_43 [1] : vector<8x8xf32> to vector<8xf32>
    %135 = vector.shape_cast %134 : vector<8xf32> to vector<8x1xf32>
    %136 = arith.addf %122, %135 : vector<8x1xf32>
    %137 = math.sqrt %136 : vector<8x1xf32>
    %cst_44 = arith.constant 0.000000e+00 : f32
    %138 = vector.broadcast %cst_44 : f32 to vector<8x1xf32>
    %139 = arith.select %11, %137, %138 : vector<8x1xi1>, vector<8x1xf32>
    %c0_45 = arith.constant 0 : index
    %c0_46 = arith.constant 0 : index
    %140 = vector.load %arg5[%c0_45, %c0_46] : memref<8x1xf32, #tpu.memory_space<vmem>>, vector<8x1xf32>
    %141 = arith.addf %140, %22 : vector<8x1xf32>
    %c0_47 = arith.constant 0 : index
    %c0_48 = arith.constant 0 : index
    %142 = vector.load %arg5[%c0_47, %c0_48] : memref<8x1xf32, #tpu.memory_space<vmem>>, vector<8x1xf32>
    tpu.vector_store %arg5[%c0_47, %c0_48], %141 {strides = array<i32>} : memref<8x1xf32, #tpu.memory_space<vmem>>, vector<8x1xf32>,
    %c0_49 = arith.constant 0 : index
    %c0_50 = arith.constant 0 : index
    %143 = vector.load %arg6[%c0_49, %c0_50] : memref<8x1xf32, #tpu.memory_space<vmem>>, vector<8x1xf32>
    %144 = arith.addf %143, %139 : vector<8x1xf32>
    %c0_51 = arith.constant 0 : index
    %c0_52 = arith.constant 0 : index
    %145 = vector.load %arg6[%c0_51, %c0_52] : memref<8x1xf32, #tpu.memory_space<vmem>>, vector<8x1xf32>
    tpu.vector_store %arg6[%c0_51, %c0_52], %144 {strides = array<i32>} : memref<8x1xf32, #tpu.memory_space<vmem>>, vector<8x1xf32>,
    %c0_i32_53 = arith.constant 0 : i32
    %146 = arith.cmpi eq, %arg0, %c0_i32_53 : i32
    %147 = arith.extui %146 : i1 to i32
    %c0_i32_54 = arith.constant 0 : i32
    %148 = arith.cmpi ne, %147, %c0_i32_54 : i32
    scf.if %148 {
      %c0_55 = arith.constant 0 : index
      %c0_56 = arith.constant 0 : index
      %149 = vector.load %arg5[%c0_55, %c0_56] : memref<8x1xf32, #tpu.memory_space<vmem>>, vector<8x1xf32>
      %cst_57 = arith.constant 1.250000e-01 : f32
      %150 = vector.broadcast %cst_57 : f32 to vector<8x1xf32>
      %151 = arith.mulf %149, %150 : vector<8x1xf32>
      %c0_58 = arith.constant 0 : index
      %c0_59 = arith.constant 0 : index
      %152 = vector.load %arg6[%c0_58, %c0_59] : memref<8x1xf32, #tpu.memory_space<vmem>>, vector<8x1xf32>
      %cst_60 = arith.constant 1.250000e-04 : f32
      %153 = vector.broadcast %cst_60 : f32 to vector<8x1xf32>
      %154 = arith.mulf %152, %153 : vector<8x1xf32>
      %155 = arith.addf %151, %154 : vector<8x1xf32>
      %cst_61 = arith.constant dense<0.000000e+00> : vector<1xf32>
      %156 = vector.multi_reduction <add>, %155, %cst_61 [0] : vector<8x1xf32> to vector<1xf32>
      %157 = vector.shape_cast %156 : vector<1xf32> to vector<1x1xf32>
      %c0_62 = arith.constant 0 : index
      %c0_63 = arith.constant 0 : index
      %158 = vector.load %arg4[%c0_62, %c0_63] : memref<1x1xf32, #tpu.memory_space<vmem>>, vector<1x1xf32>
      tpu.vector_store %arg4[%c0_62, %c0_63], %157 {strides = array<i32>} : memref<1x1xf32, #tpu.memory_space<vmem>>, vector<1x1xf32>,
    } else {
    }
    return
  }
  func.func @transform_0(%arg0: i32) -> (i32, i32) {
    %c0_i32 = arith.constant 0 : i32
    %c0_i32_0 = arith.constant 0 : i32
    return %arg0, %c0_i32 : i32, i32
  }
  func.func @transform_1(%arg0: i32) -> (i32, i32) {
    %c0_i32 = arith.constant 0 : i32
    %c0_i32_0 = arith.constant 0 : i32
    return %arg0, %c0_i32 : i32, i32
  }
  func.func @transform_2(%arg0: i32) -> (i32, i32, i32) {
    %c0_i32 = arith.constant 0 : i32
    %c0_i32_0 = arith.constant 0 : i32
    %c0_i32_1 = arith.constant 0 : i32
    return %arg0, %c0_i32, %c0_i32_0 : i32, i32, i32
  }
  func.func @transform_3(%arg0: i32) -> (i32, i32) {
    %c0_i32 = arith.constant 0 : i32
    %c0_i32_0 = arith.constant 0 : i32
    %c0_i32_1 = arith.constant 0 : i32
    return %c0_i32, %c0_i32_0 : i32, i32
  }
}

</mosaic_0001>

<bundles_post_ra>
// kernel: tpu_custom_call.1
= control target key start
LH: loop header
LB: loop body
LE: loop exit
PB: predicated region body
PF: predicated region fallthrough
CT: control target
= control target key end

     0   :  { %8 = vsyncpa [#allocation5], 0  ;;  %s2062_s0 = inlined_call_operand.vmem [shape: f32[8,10], index: 0, kind: input, shape index: {}]   ;;  %s2063_s1 = inlined_call_operand.vmem [shape: s32[8,1], index: 1, kind: input, shape index: {}]   ;;  %s2064_s2 = inlined_call_operand.hbm [shape: f32[8,8,8], index: 2, kind: input, shape index: {}]   ;;  %s2065_s3 = inlined_call_operand.hbm [shape: f32[1,1], index: 3, kind: output, shape index: {}]  }
   0x1   :  { %9 = vsyncpa [#allocation6], 0  ;;  %s1488_s12 = smov [#allocation4]   ;;  %s1440_s16 = scalar_lea.hbm %s2064_s2, 1024 }
   0x2   :  { %s19_s13 = sshll.u32 %s1488_s12, 4  ;;  %p1441_p0 = scmp.ne.s32.totalorder %s2064_s2, %s1440_s16  ;;  %s20_s13 = int_to_ptr.vmem [resolvable:$true] %s19_s13 }
   0x3   :  { %p1444_p1 = scmp.lt.u32.totalorder %s1440_s16, %s2064_s2 }
   0x5   :  { %p1446_p2 = pnand %p1444_p1, %p1441_p0 }
   0x7   :  { %1449 = shalt.err (!%p1446_p2)
}
   0x8   :  { %s1450_s21 = scalar_lea.vmem %s20_s13, 1024  ;;  %p1455_p4 = scmp.lt.s32.totalorder %s20_s13, %s20_s13 }
   0x9   :  { %p1451_p3 = scmp.ne.s32.totalorder %s20_s13, %s1450_s21  ;;  %p1456_p5 = scmp.lt.s32.totalorder %s1450_s21, %s1450_s21 }
   0xb   :  { %p1457_p6 = por %p1456_p5, %p1455_p4 }
   0xd   :  { %p1458_p7 = pnand %p1457_p6, %p1451_p3 }
   0xf   :  { %1461 = shalt.err (!%p1458_p7)
}
  0x10   :  { %s1489_s22 = smov 128   ;;  %s1490_s23 = smov 8  }
  0x11   :  { %25 = dma.hbm_to_vmem [thread:$0]  %s2064_s2, 1024, %s20_s13, [#allocation5], %s1489_s22, %s1489_s22, %s1490_s23  }
  0x12   :  { %1484 = dma.done.wait [#allocation5], 1024  }
  0x13   :  { %1485 = vsyncadd [#allocation5], 4294966272  ;;  %v52_v0 = vlaneseq  ;;  %v1491_v1 = vmov 0   ;;  %v1530_v4 = vld [vmem:[#allocation4] sm:$0xff]  ;;  %v1532_v5 = vld [vmem:[#allocation4 + $0x8] sm:$0xff]  ;;  %vm107_vm0 = vcmask 64512  }
  0x14   :  { %1432 = vset.pattern.permute.xlu0 %v1491_v1  ;;  %1433 = vset.pattern.permute.xlu1 %v1491_v1  ;;  %v37_v6 = vld [vmem:[%s2063_s1] sm:$0xff]  ;;  %v1544_v13 = vld [vmem:[#allocation4 + $0x18] sm:$0xff]  ;;  %v1550_v18 = vld [vmem:[#allocation4 + $0x20] sm:$0xff]  ;;  %v1492_v58 = vmov 0.0   ;;  %vm62_vm3 = vcmask 80896   ;;  %vm33_vm5 = vcmask 7168  }
  0x15   :  { %v1527_v2 = vshrl.u32 %v52_v0, 7  ;;  %55 = vperm.xlu0 %1432, %v37_v6   ;;  %v1539_v9 = vld [vmem:[#allocation4 + $0x10] sm:$0xff]  ;;  %v1555_v22 = vld [vmem:[#allocation4 + $0x28] sm:$0xff]  ;;  %v1568_v31 = vld [vmem:[#allocation4 + $0x38] sm:$0xff]  ;;  %v1597_v51 = vand.u32 127, %v52_v0  ;;  %34 = vst.msk [vmem:[#allocation2] sm:$0xff] %vm33_vm5, %v1492_v58 }
  0x16   :  { %v1560_v26 = vld [vmem:[#allocation4 + $0x30] sm:$0xff]  ;;  %35 = vst.msk [vmem:[#allocation3] sm:$0xff] %vm33_vm5, %v1492_v58  ;;  %vm219_vm8 = vcmask 1041409   ;;  %vm221_vm9 = vcmask 1042434   ;;  %vm223_vm10 = vcmask 1043459   ;;  %vm225_vm11 = vcmask 1044484  }
  0x17   :  { %v69_v3 = vsub.s32 0, %v1527_v2  ;;  %v1563_v27 = vsub.s32 1, %v1527_v2  ;;  %v1594_v50 = vsub.s32 2, %v1527_v2  ;;  %vm132_vm1 = vcmp.eq.s32.totalorder %v1597_v51, 0 }
  0x18   :  { %v133_v59 = vsel %vm132_vm1, 1.0, %v1492_v58  ;;  %vm302_vm2 = vcmp.eq.s32.totalorder %v1597_v51, 1  ;;  %vm465_vm6 = vcmp.eq.s32.totalorder %v1597_v51, 2  ;;  %vm628_vm7 = vcmp.eq.s32.totalorder %v1597_v51, 3 }
  0x19   :  { %v70_v7 = vrot.slane %v1530_v4, %v69_v3  ;;  %v74_v8 = vrot.slane %v1532_v5, %v69_v3  ;;  %v78_v12 = vrot.slane %v1539_v9, %v69_v3  ;;  %v82_v17 = vrot.slane %v1544_v13, %v69_v3 }
  0x1a   :  { %v86_v21 = vrot.slane %v1550_v18, %v69_v3  ;;  %v90_v25 = vrot.slane %v1555_v22, %v69_v3  ;;  %v94_v30 = vrot.slane %v1560_v26, %v69_v3  ;;  %v241_v32 = vrot.slane %v1530_v4, %v1563_v27 }
  0x1b   :  { %v99_v10 = vmul.f32 %v70_v7, %v1530_v4  ;;  %v100_v11 = vmul.f32 %v74_v8, %v1532_v5  ;;  %v101_v16 = vmul.f32 %v78_v12, %v1539_v9  ;;  %v102_v20 = vmul.f32 %v82_v17, %v1544_v13 }
  0x1c   :  { %v103_v24 = vmul.f32 %v86_v21, %v1550_v18  ;;  %v104_v29 = vmul.f32 %v90_v25, %v1555_v22  ;;  %v105_v34 = vmul.f32 %v94_v30, %v1560_v26  ;;  %v98_v35 = vrot.slane %v1568_v31, %v69_v3 }
  0x1d   :  { %v108_v14 = vsel %vm107_vm0, %v99_v10, 0.0  ;;  %v111_v15 = vsel %vm107_vm0, %v100_v11, 0.0  ;;  %v114_v19 = vsel %vm107_vm0, %v101_v16, 0.0  ;;  %v117_v23 = vsel %vm107_vm0, %v102_v20, 0.0 }
  0x1e   :  { %109 = vadd.xlane.f32.xlu1 %v108_v14  ;;  %v120_v28 = vsel %vm107_vm0, %v103_v24, 0.0  ;;  %v123_v33 = vsel %vm107_vm0, %v104_v29, 0.0  ;;  %v270_v36 = vmul.f32 %v241_v32, %v1530_v4  ;;  %v245_v37 = vrot.slane %v1532_v5, %v1563_v27 }
  0x1f   :  { %v126_v38 = vsel %vm107_vm0, %v105_v34, 0.0  ;;  %v106_v39 = vmul.f32 %v98_v35, %v1568_v31  ;;  %v253_v42 = vrot.slane %v1544_v13, %v1563_v27  ;;  %v261_v46 = vrot.slane %v1555_v22, %v1563_v27 }
  0x20   :  { %v278_v40 = vsel %vm107_vm0, %v270_v36, 0.0  ;;  %v271_v41 = vmul.f32 %v245_v37, %v1532_v5  ;;  %v269_v49 = vrot.slane %v1568_v31, %v1563_v27  ;;  %v404_v54 = vrot.slane %v1530_v4, %v1594_v50 }
  0x21   :  { %v129_v43 = vsel %vm107_vm0, %v106_v39, 0.0  ;;  %v273_v45 = vmul.f32 %v253_v42, %v1544_v13  ;;  %v275_v48 = vmul.f32 %v261_v46, %v1555_v22  ;;  %v408_v57 = vrot.slane %v1532_v5, %v1594_v50 }
  0x22   :  { %112 = vadd.xlane.f32.xlu1 %v111_v15  ;;  %v281_v44 = vsel %vm107_vm0, %v271_v41, 0.0  ;;  %v277_v53 = vmul.f32 %v269_v49, %v1568_v31  ;;  %v433_v56 = vmul.f32 %v404_v54, %v1530_v4  ;;  %v416_v62 = vrot.slane %v1544_v13, %v1594_v50 }
  0x23   :  { %v287_v47 = vsel %vm107_vm0, %v273_v45, 0.0  ;;  %v293_v52 = vsel %vm107_vm0, %v275_v48, 0.0  ;;  %v434_v61 = vmul.f32 %v408_v57, %v1532_v5  ;;  %v424_v1 = vrot.slane %v1555_v22, %v1594_v50 }
  0x24   :  { %v299_v55 = vsel %vm107_vm0, %v277_v53, 0.0  ;;  %v441_v60 = vsel %vm107_vm0, %v433_v56, 0.0  ;;  %v436_v0 = vmul.f32 %v416_v62, %v1544_v13  ;;  %v432_v7 = vrot.slane %v1568_v31, %v1594_v50 }
  0x25   :  { %v444_v63 = vsel %vm107_vm0, %v434_v61, 0.0  ;;  %v438_v6 = vmul.f32 %v424_v1, %v1555_v22  ;;  %v249_v12 = vrot.slane %v1539_v9, %v1563_v27  ;;  %v257_v15 = vrot.slane %v1550_v18, %v1563_v27 }
  0x26   :  { %115 = vadd.xlane.f32.xlu1 %v114_v19  ;;  %v450_v3 = vsel %vm107_vm0, %v436_v0, 0.0  ;;  %v440_v10 = vmul.f32 %v432_v7, %v1568_v31  ;;  %v265_v19 = vrot.slane %v1560_v26, %v1563_v27  ;;  %v303_v24 = vsel %vm302_vm2, 1.0, %v1492_v58 }
  0x27   :  { %v456_v8 = vsel %vm107_vm0, %v438_v6, 0.0  ;;  %v272_v14 = vmul.f32 %v249_v12, %v1539_v9  ;;  %v274_v17 = vmul.f32 %v257_v15, %v1550_v18  ;;  %v1639_v25 = vsub.s32 3, %v1527_v2 }
  0x28   :  { %v462_v11 = vsel %vm107_vm0, %v440_v10, 0.0  ;;  %v276_v21 = vmul.f32 %v265_v19, %v1560_v26  ;;  %v428_v49 = vrot.slane %v1560_v26, %v1594_v50  ;;  %v466_v0 = vsel %vm465_vm6, 1.0, %v1492_v58 }
  0x29   :  { %v284_v16 = vsel %vm107_vm0, %v272_v14, 0.0  ;;  %v290_v20 = vsel %vm107_vm0, %v274_v17, 0.0  ;;  %v567_v27 = vrot.slane %v1530_v4, %v1639_v25  ;;  %v571_v32 = vrot.slane %v1532_v5, %v1639_v25 }
  0x2a   :  { %118 = vadd.xlane.f32.xlu1 %v117_v23  ;;  %v296_v23 = vsel %vm107_vm0, %v276_v21, 0.0  ;;  %v579_v37 = vrot.slane %v1544_v13, %v1639_v25  ;;  %v587_v41 = vrot.slane %v1555_v22, %v1639_v25  ;;  %v595_v46 = vrot.slane %v1568_v31, %v1639_v25 }
  0x2b   :  { %v596_v30 = vmul.f32 %v567_v27, %v1530_v4  ;;  %v597_v36 = vmul.f32 %v571_v32, %v1532_v5  ;;  %v439_v56 = vmul.f32 %v428_v49, %v1560_v26  ;;  %v575_v17 = vrot.slane %v1539_v9, %v1639_v25 }
  0x2c   :  { %v601_v45 = vmul.f32 %v587_v41, %v1555_v22  ;;  %v603_v53 = vmul.f32 %v595_v46, %v1568_v31  ;;  %vm227_vm12 = vcmask 1045509   ;;  %vm229_vm13 = vcmask 1046534  }
  0x2d   :  { %v604_v35 = vsel %vm107_vm0, %v596_v30, 0.0  ;;  %v607_v39 = vsel %vm107_vm0, %v597_v36, 0.0  ;;  %v598_v19 = vmul.f32 %v575_v17, %v1539_v9  ;;  %vm231_vm14 = vcmask 1047559  }
  0x2e   :  { %121 = vadd.xlane.f32.xlu1 %v120_v28  ;;  %v36_v28 = vld [vmem:[%s2062_s0] sm:$0xff]  ;;  %v625_v57 = vsel %vm107_vm0, %v603_v53, 0.0  ;;  %vm791_vm15 = vcmp.eq.s32.totalorder %v1597_v51, 4  ;;  %vm954_vm1 = vcmp.eq.s32.totalorder %v1597_v51, 5  ;;  %vm1280_vm2 = vcmp.eq.s32.totalorder %v1597_v51, 7  ;;  %s1493_s0 = smov [#allocation7]  }
  0x2f   :  { %v610_v21 = vsel %vm107_vm0, %v598_v19, 0.0  ;;  %s1417_s28 = sshll.u32 %s1493_s0, 4  ;;  %s1418_s28 = int_to_ptr.vmem [resolvable:$true] %s1417_s28 }
  0x30   :  { %s1462_s29 = scalar_lea.vmem %s1418_s28, 16  ;;  %s1466_s30 = scalar_lea.vmem %s1418_s28, 32 }
  0x31   :  { %p1463_p8 = scmp.ne.s32.totalorder %s1418_s28, %s1462_s29  ;;  %p1467_p9 = scmp.lt.s32.totalorder %s1418_s28, %s1418_s28 }
  0x32   :  { %124 = vadd.xlane.f32.xlu1 %v123_v33  ;;  %p1468_p10 = scmp.lt.s32.totalorder %s1466_s30, %s1462_s29 }
  0x34   :  { %279 = vadd.xlane.f32.xlu0 %v278_v40  ;;  %v599_v40 = vmul.f32 %v579_v37, %v1544_v13  ;;  %p1469_p11 = por %p1468_p10, %p1467_p9 }
  0x36   :  { %127 = vadd.xlane.f32.xlu1 %v126_v38  ;;  %v412_v38 = vrot.slane %v1539_v9, %v1594_v50  ;;  %p1470_p12 = pnand %p1469_p11, %p1463_p8 }
  0x38   :  { %282 = vadd.xlane.f32.xlu0 %v281_v44  ;;  %v435_v42 = vmul.f32 %v412_v38, %v1539_v9  ;;  %v613_v44 = vsel %vm107_vm0, %v599_v40, 0.0 }
  0x3a   :  { %130 = vadd.xlane.f32.xlu1 %v129_v43  ;;  %v420_v43 = vrot.slane %v1550_v18, %v1594_v50 }
  0x3c   :  { %288 = vadd.xlane.f32.xlu0 %v287_v47  ;;  %v447_v47 = vsel %vm107_vm0, %v435_v42, 0.0  ;;  %v437_v48 = vmul.f32 %v420_v43, %v1550_v18 }
  0x40   :  { %294 = vadd.xlane.f32.xlu0 %v293_v52  ;;  %v619_v52 = vsel %vm107_vm0, %v601_v45, 0.0 }
  0x44   :  { %300 = vadd.xlane.f32.xlu0 %v299_v55  ;;  %v453_v55 = vsel %vm107_vm0, %v437_v48, 0.0 }
  0x48   :  { %442 = vadd.xlane.f32.xlu0 %v441_v60  ;;  %v459_v60 = vsel %vm107_vm0, %v439_v56, 0.0 }
  0x4b   :  { %136 = vbcast.lane.b32.xlu1 %v133_v59, 256 }
  0x4c   :  { %445 = vadd.xlane.f32.xlu0 %v444_v63 }
  0x50   :  { %451 = vadd.xlane.f32.xlu0 %v450_v3 }
  0x54   :  { %457 = vadd.xlane.f32.xlu0 %v456_v8 }
  0x58   :  { %463 = vadd.xlane.f32.xlu0 %v462_v11 }
  0x6f   :  { %285 = vadd.xlane.f32.xlu1 %v284_v16 }
  0x73   :  { %291 = vadd.xlane.f32.xlu1 %v290_v20  ;;  %v583_v20 = vrot.slane %v1550_v18, %v1639_v25 }
  0x77   :  { %297 = vadd.xlane.f32.xlu1 %v296_v23  ;;  %v600_v23 = vmul.f32 %v583_v20, %v1550_v18 }
  0x79   :  { %v616_v27 = vsel %vm107_vm0, %v600_v23, 0.0 }
  0x88   :  { %306 = vbcast.lane.b32.xlu1 %v303_v24, 256  ;;  %v591_v24 = vrot.slane %v1560_v26, %v1639_v25 }
  0x94   :  { %v56_v29 = vpop.permute.xlu0 %55 }
  0x95   :  { %vm57_vm4 = vcmp.eq.s32.totalorder %v1597_v51, %v56_v29 }
  0x96   :  { %v61_v33 = vsel %vm57_vm4, %v36_v28, 0.0  ;;  %v602_v28 = vmul.f32 %v591_v24, %v1560_v26 }
  0x97   :  { %v63_v34 = vsel %vm62_vm3, %v61_v33, 0.0  ;;  %vm1117_vm3 = vcmp.eq.s32.totalorder %v1597_v51, 6 }
  0x98   :  { %64 = vadd.xlane.f32.xlu0 %v63_v34  ;;  %v622_v29 = vsel %vm107_vm0, %v602_v28, 0.0 }
  0x9c   :  { %605 = vadd.xlane.f32.xlu0 %v604_v35 }
  0xa0   :  { %608 = vadd.xlane.f32.xlu0 %v607_v39 }
  0xa4   :  { %614 = vadd.xlane.f32.xlu0 %v613_v44 }
  0xa8   :  { %620 = vadd.xlane.f32.xlu0 %v619_v52 }
  0xab   :  { %v110_v54 = vpop.xlane.xlu1 %109 }
  0xac   :  { %448 = vadd.xlane.f32.xlu1 %v447_v47  ;;  %626 = vadd.xlane.f32.xlu0 %v625_v57 }
  0xaf   :  { %v113_v59 = vpop.xlane.xlu1 %112 }
  0xb0   :  { %454 = vadd.xlane.f32.xlu1 %v453_v55 }
  0xb3   :  { %v116_v61 = vpop.xlane.xlu1 %115 }
  0xb4   :  { %460 = vadd.xlane.f32.xlu1 %v459_v60 }
  0xb7   :  { %v119_v50 = vpop.xlane.xlu1 %118 }
  0xbb   :  { %v122_v62 = vpop.xlane.xlu1 %121 }
  0xbf   :  { %v125_v63 = vpop.xlane.xlu1 %124 }
  0xc1   :  { %v280_v30 = vpop.xlane.xlu0 %279 }
  0xc3   :  { %v128_v1 = vpop.xlane.xlu1 %127 }
  0xc5   :  { %469 = vbcast.lane.b32.xlu1 %v466_v0, 256  ;;  %v283_v32 = vpop.xlane.xlu0 %282 }
  0xc7   :  { %v131_v3 = vpop.xlane.xlu1 %130 }
  0xc9   :  { %v289_v33 = vpop.xlane.xlu0 %288 }
  0xcb   :  { %v137_v6 = vpop.permute.xlu1 %136 }
  0xcc   :  { %v139_v7 = vsub.f32 %v110_v54, %v137_v6  ;;  %v142_v10 = vsub.f32 %v119_v50, %v137_v6  ;;  %v144_v12 = vsub.f32 %v125_v63, %v137_v6  ;;  %v146_v15 = vsub.f32 %v131_v3, %v137_v6 }
  0xcd   :  { %v140_v35 = vsub.f32 %v113_v59, %v137_v6  ;;  %v141_v38 = vsub.f32 %v116_v61, %v137_v6  ;;  %v295_v39 = vpop.xlane.xlu0 %294  ;;  %v143_v41 = vsub.f32 %v122_v62, %v137_v6  ;;  %v145_v45 = vsub.f32 %v128_v1, %v137_v6 }
  0xce   :  { %v147_v8 = vmul.f32 %v139_v7, %v139_v7  ;;  %v150_v11 = vmul.f32 %v142_v10, %v142_v10  ;;  %v152_v14 = vmul.f32 %v144_v12, %v144_v12  ;;  %v154_v16 = vmul.f32 %v146_v15, %v146_v15 }
  0xcf   :  { %v148_v37 = vmul.f32 %v140_v35, %v140_v35  ;;  %v149_v40 = vmul.f32 %v141_v38, %v141_v38  ;;  %v151_v44 = vmul.f32 %v143_v41, %v143_v41  ;;  %v153_v52 = vmul.f32 %v145_v45, %v145_v45 }
  0xd0   :  { %164 = vperm.xlu0 %1432, %v147_v8  }
  0xd1   :  { %v301_v42 = vpop.xlane.xlu0 %300 }
  0xd4   :  { %173 = vperm.xlu0 %1432, %v150_v11   ;;  %v1387_v11 = vld [vmem:[#allocation2] sm:$0xff] }
  0xd5   :  { %v443_v49 = vpop.xlane.xlu0 %442 }
  0xd8   :  { %179 = vperm.xlu0 %1432, %v152_v14  }
  0xd9   :  { %v446_v59 = vpop.xlane.xlu0 %445 }
  0xdc   :  { %185 = vperm.xlu0 %1432, %v154_v16  }
  0xdd   :  { %v452_v0 = vpop.xlane.xlu0 %451 }
  0xe1   :  { %v458_v7 = vpop.xlane.xlu0 %457 }
  0xe5   :  { %v464_v8 = vpop.xlane.xlu0 %463 }
  0xe9   :  { %611 = vadd.xlane.f32.xlu1 %v610_v21 }
  0xed   :  { %617 = vadd.xlane.f32.xlu1 %v616_v27 }
  0xf1   :  { %623 = vadd.xlane.f32.xlu1 %v622_v29 }
  0xfc   :  { %v286_v34 = vpop.xlane.xlu1 %285 }
 0x100   :  { %v292_v36 = vpop.xlane.xlu1 %291 }
 0x102   :  { %167 = vperm.xlu1 %1433, %v148_v37  }
 0x104   :  { %v298_v25 = vpop.xlane.xlu1 %297 }
 0x106   :  { %170 = vperm.xlu1 %1433, %v149_v40  }
 0x108   :  { %v307_v43 = vpop.permute.xlu1 %306 }
 0x109   :  { %v309_v46 = vsub.f32 %v280_v30, %v307_v43  ;;  %v312_v48 = vsub.f32 %v289_v33, %v307_v43  ;;  %v310_v53 = vsub.f32 %v283_v32, %v307_v43  ;;  %v314_v55 = vsub.f32 %v295_v39, %v307_v43 }
 0x10a   :  { %176 = vperm.xlu1 %1433, %v151_v44   ;;  %v311_v57 = vsub.f32 %v286_v34, %v307_v43  ;;  %v316_v60 = vsub.f32 %v301_v42, %v307_v43  ;;  %v313_v62 = vsub.f32 %v292_v36, %v307_v43  ;;  %v315_v3 = vsub.f32 %v298_v25, %v307_v43 }
 0x10b   :  { %v317_v47 = vmul.f32 %v309_v46, %v309_v46  ;;  %v320_v54 = vmul.f32 %v312_v48, %v312_v48  ;;  %v318_v56 = vmul.f32 %v310_v53, %v310_v53  ;;  %v322_v61 = vmul.f32 %v314_v55, %v314_v55 }
 0x10c   :  { %v319_v50 = vmul.f32 %v311_v57, %v311_v57  ;;  %v324_v63 = vmul.f32 %v316_v60, %v316_v60  ;;  %v321_v1 = vmul.f32 %v313_v62, %v313_v62  ;;  %v323_v6 = vmul.f32 %v315_v3, %v315_v3 }
 0x10d   :  { %334 = vperm.xlu0 %1432, %v317_v47   ;;  %v629_v25 = vsel %vm628_vm7, 1.0, %v1492_v58 }
 0x10e   :  { %182 = vperm.xlu1 %1433, %v153_v52  }
 0x111   :  { %343 = vperm.xlu0 %1432, %v320_v54  }
 0x112   :  { %337 = vperm.xlu1 %1433, %v318_v56  }
 0x115   :  { %349 = vperm.xlu0 %1432, %v322_v61  }
 0x116   :  { %340 = vperm.xlu1 %1433, %v319_v50  }
 0x119   :  { %355 = vperm.xlu0 %1432, %v324_v63  }
 0x11a   :  { %346 = vperm.xlu1 %1433, %v321_v1  }
 0x11e   :  { %352 = vperm.xlu1 %1433, %v323_v6  }
 0x125   :  { %v65_v10 = vpop.xlane.xlu0 %64 }
 0x126   :  { %v66_v12 = vsub.f32 0.0, %v65_v10 }
 0x128   :  { %v1388_v14 = vadd.f32 %v1387_v11, %v66_v12 }
 0x129   :  { %v606_v45 = vpop.xlane.xlu0 %605 }
 0x12a   :  { %1390 = vst.msk [vmem:[#allocation2] sm:$0xff] %vm33_vm5, %v1388_v14 }
 0x12d   :  { %v609_v47 = vpop.xlane.xlu0 %608 }
 0x139   :  { %v449_v15 = vpop.xlane.xlu1 %448 }
 0x13d   :  { %v455_v16 = vpop.xlane.xlu1 %454 }
 0x141   :  { %v461_v17 = vpop.xlane.xlu1 %460 }
 0x145   :  { %v470_v19 = vpop.permute.xlu1 %469 }
 0x146   :  { %v473_v20 = vsub.f32 %v446_v59, %v470_v19  ;;  %v472_v21 = vsub.f32 %v443_v49, %v470_v19  ;;  %v474_v27 = vsub.f32 %v449_v15, %v470_v19  ;;  %v475_v28 = vsub.f32 %v452_v0, %v470_v19  ;;  %v615_v49 = vpop.xlane.xlu0 %614 }
 0x147   :  { %v476_v32 = vsub.f32 %v455_v16, %v470_v19  ;;  %v477_v33 = vsub.f32 %v458_v7, %v470_v19  ;;  %v478_v36 = vsub.f32 %v461_v17, %v470_v19  ;;  %v479_v37 = vsub.f32 %v464_v8, %v470_v19 }
 0x148   :  { %v481_v23 = vmul.f32 %v473_v20, %v473_v20  ;;  %v480_v24 = vmul.f32 %v472_v21, %v472_v21  ;;  %v482_v29 = vmul.f32 %v474_v27, %v474_v27  ;;  %v483_v30 = vmul.f32 %v475_v28, %v475_v28 }
 0x149   :  { %v484_v34 = vmul.f32 %v476_v32, %v476_v32  ;;  %v485_v35 = vmul.f32 %v477_v33, %v477_v33  ;;  %v486_v38 = vmul.f32 %v478_v36, %v478_v36  ;;  %v487_v39 = vmul.f32 %v479_v37, %v479_v37 }
 0x14a   :  { %500 = vperm.xlu1 %1433, %v481_v23   ;;  %497 = vperm.xlu0 %1432, %v480_v24   ;;  %v621_v53 = vpop.xlane.xlu0 %620  ;;  %v1730_v28 = vsub.s32 %v1597_v51, %v1527_v2 }
 0x14e   :  { %503 = vperm.xlu1 %1433, %v482_v29   ;;  %506 = vperm.xlu0 %1432, %v483_v30   ;;  %v627_v55 = vpop.xlane.xlu0 %626 }
 0x152   :  { %509 = vperm.xlu1 %1433, %v484_v34   ;;  %512 = vperm.xlu0 %1432, %v485_v35   ;;  %v165_v57 = vpop.permute.xlu0 %164 }
 0x153   :  { %v190_v33 = vrot.slane %v165_v57, %v1730_v28 }
 0x156   :  { %515 = vperm.xlu1 %1433, %v486_v38   ;;  %518 = vperm.xlu0 %1432, %v487_v39   ;;  %v174_v61 = vpop.permute.xlu0 %173 }
 0x157   :  { %v202_v37 = vrot.slane %v174_v61, %v1730_v28 }
 0x15a   :  { %632 = vbcast.lane.b32.xlu1 %v629_v25, 256  ;;  %v180_v62 = vpop.permute.xlu0 %179 }
 0x15e   :  { %v1718_v1 = vpop.permute.xlu0 %185 }
 0x176   :  { %v612_v40 = vpop.xlane.xlu1 %611 }
 0x17a   :  { %v1698_v41 = vpop.xlane.xlu1 %617 }
 0x17e   :  { %v1700_v42 = vpop.xlane.xlu1 %623 }
 0x182   :  { %v168_v43 = vpop.permute.xlu1 %167 }
 0x183   :  { %v194_v29 = vrot.slane %v168_v43, %v1730_v28 }
 0x185   :  { %v220_v34 = vsel %vm219_vm8, %v194_v29, %v190_v33 }
 0x186   :  { %v171_v44 = vpop.permute.xlu1 %170 }
 0x187   :  { %v198_v30 = vrot.slane %v171_v44, %v1730_v28 }
 0x189   :  { %v222_v35 = vsel %vm221_vm9, %v198_v30, %v220_v34 }
 0x18a   :  { %v177_v46 = vpop.permute.xlu1 %176 }
 0x18b   :  { %v206_v36 = vrot.slane %v177_v46, %v1730_v28 }
 0x18c   :  { %v335_v8 = vpop.permute.xlu0 %334 }
 0x18d   :  { %v360_v43 = vrot.slane %v335_v8, %v1730_v28 }
 0x18e   :  { %v1702_v48 = vpop.permute.xlu1 %182 }
 0x190   :  { %v344_v19 = vpop.permute.xlu0 %343 }
 0x191   :  { %v372_v57 = vrot.slane %v344_v19, %v1730_v28 }
 0x192   :  { %v338_v52 = vpop.permute.xlu1 %337 }
 0x193   :  { %v364_v38 = vrot.slane %v338_v52, %v1730_v28  ;;  %v210_v52 = vrot.slane %v180_v62, %v1730_v28 }
 0x194   :  { %v350_v23 = vpop.permute.xlu0 %349 }
 0x195   :  { %v389_v46 = vsel %vm219_vm8, %v364_v38, %v360_v43 }
 0x196   :  { %v1704_v54 = vpop.permute.xlu1 %340 }
 0x197   :  { %v368_v39 = vrot.slane %v1704_v54, %v1730_v28 }
 0x198   :  { %v356_v27 = vpop.permute.xlu0 %355 }
 0x19a   :  { %v1706_v56 = vpop.permute.xlu1 %346 }
 0x19b   :  { %v376_v54 = vrot.slane %v1706_v56, %v1730_v28 }
 0x19e   :  { %v1708_v59 = vpop.permute.xlu1 %352 }
 0x19f   :  { %v384_v56 = vrot.slane %v1708_v59, %v1730_v28 }
 0x1c9   :  { %v1710_v60 = vpop.permute.xlu1 %500  ;;  %v498_v32 = vpop.permute.xlu0 %497 }
 0x1cd   :  { %v1712_v50 = vpop.permute.xlu1 %503  ;;  %v507_v25 = vpop.permute.xlu0 %506 }
 0x1ce   :  { %v535_v62 = vrot.slane %v507_v25, %v1730_v28 }
 0x1d1   :  { %v1714_v63 = vpop.permute.xlu1 %509 }
 0x1d5   :  { %v1716_v0 = vpop.permute.xlu1 %515 }
 0x1d6   :  { %v547_v19 = vrot.slane %v1716_v0, %v1730_v28 }
 0x1d9   :  { %v1720_v3 = vpop.permute.xlu1 %632 }
 0x1da   :  { %v635_v6 = vsub.f32 %v606_v45, %v1720_v3  ;;  %v636_v7 = vsub.f32 %v609_v47, %v1720_v3  ;;  %v637_v12 = vsub.f32 %v612_v40, %v1720_v3  ;;  %v638_v14 = vsub.f32 %v615_v49, %v1720_v3 }
 0x1db   :  { %v640_v17 = vsub.f32 %v621_v53, %v1720_v3  ;;  %v642_v21 = vsub.f32 %v627_v55, %v1720_v3  ;;  %v224_v40 = vsel %vm223_vm10, %v202_v37, %v222_v35  ;;  %v214_v45 = vrot.slane %v1702_v48, %v1730_v28  ;;  %v513_v48 = vpop.permute.xlu0 %512 }
 0x1dc   :  { %v643_v10 = vmul.f32 %v635_v6, %v635_v6  ;;  %v644_v11 = vmul.f32 %v636_v7, %v636_v7  ;;  %v645_v15 = vmul.f32 %v637_v12, %v637_v12  ;;  %v646_v16 = vmul.f32 %v638_v14, %v638_v14 }
 0x1dd   :  { %v648_v20 = vmul.f32 %v640_v17, %v640_v17  ;;  %v650_v24 = vmul.f32 %v642_v21, %v642_v21  ;;  %v226_v44 = vsel %vm225_vm11, %v206_v36, %v224_v40  ;;  %v527_v47 = vrot.slane %v1710_v60, %v1730_v28 }
 0x1de   :  { %660 = vperm.xlu0 %1432, %v643_v10   ;;  %663 = vperm.xlu1 %1433, %v644_v11   ;;  %v523_v49 = vrot.slane %v498_v32, %v1730_v28  ;;  %v390_v53 = vsel %vm221_vm9, %v368_v39, %v389_v46  ;;  %v531_v55 = vrot.slane %v1712_v50, %v1730_v28  ;;  %v1794_v37 = vsub.s32 4, %v1527_v2 }
 0x1df   :  { %v228_v61 = vsel %vm227_vm12, %v210_v52, %v226_v44  ;;  %v391_v60 = vsel %vm223_vm10, %v372_v57, %v390_v53  ;;  %v539_v10 = vrot.slane %v1714_v63, %v1730_v28  ;;  %v218_v11 = vrot.slane %v1718_v1, %v1730_v28 }
 0x1e0   :  { %v552_v6 = vsel %vm219_vm8, %v527_v47, %v523_v49  ;;  %v230_v7 = vsel %vm229_vm13, %v214_v45, %v228_v61  ;;  %v392_v8 = vsel %vm225_vm11, %v376_v54, %v391_v60  ;;  %v380_v12 = vrot.slane %v350_v23, %v1730_v28 }
 0x1e1   :  { %v553_v50 = vsel %vm221_vm9, %v531_v55, %v552_v6  ;;  %v388_v1 = vrot.slane %v356_v27, %v1730_v28  ;;  %v639_v27 = vsub.f32 %v1698_v41, %v1720_v3  ;;  %v641_v35 = vsub.f32 %v1700_v42, %v1720_v3 }
 0x1e2   :  { %666 = vperm.xlu1 %1433, %v645_v15   ;;  %669 = vperm.xlu0 %1432, %v646_v16   ;;  %v554_v14 = vsel %vm223_vm10, %v535_v62, %v553_v50  ;;  %v543_v15 = vrot.slane %v513_v48, %v1730_v28  ;;  %v232_v16 = vsel %vm231_vm14, %v218_v11, %v230_v7  ;;  %v1817_v54 = vsub.s32 5, %v1527_v2 }
 0x1e3   :  { %v393_v17 = vsel %vm227_vm12, %v380_v12, %v392_v8  ;;  %v555_v59 = vsel %vm225_vm11, %v539_v10, %v554_v14  ;;  %v234_v21 = vsel %vm107_vm0, %v232_v16, 0.0  ;;  %v647_v34 = vmul.f32 %v639_v27, %v639_v27 }
 0x1e4   :  { %v394_v63 = vsel %vm229_vm13, %v384_v56, %v393_v17  ;;  %v556_v23 = vsel %vm227_vm12, %v543_v15, %v555_v59  ;;  %v649_v36 = vmul.f32 %v641_v35, %v641_v35  ;;  %v730_v38 = vrot.slane %v1530_v4, %v1794_v37 }
 0x1e5   :  { %v395_v29 = vsel %vm231_vm14, %v388_v1, %v394_v63  ;;  %v557_v30 = vsel %vm229_vm13, %v547_v19, %v556_v23  ;;  %v734_v25 = vrot.slane %v1532_v5, %v1794_v37  ;;  %v742_v3 = vrot.slane %v1544_v13, %v1794_v37 }
 0x1e6   :  { %675 = vperm.xlu0 %1432, %v648_v20   ;;  %v519_v20 = vpop.permute.xlu0 %518  ;;  %v397_v32 = vsel %vm107_vm0, %v395_v29, 0.0  ;;  %v759_v39 = vmul.f32 %v730_v38, %v1530_v4  ;;  %v750_v45 = vrot.slane %v1555_v22, %v1794_v37  ;;  %v758_v49 = vrot.slane %v1568_v31, %v1794_v37 }
 0x1e7   :  { %v760_v40 = vmul.f32 %v734_v25, %v1532_v5  ;;  %v762_v43 = vmul.f32 %v742_v3, %v1544_v13  ;;  %v897_v55 = vrot.slane %v1532_v5, %v1817_v54  ;;  %v905_v60 = vrot.slane %v1544_v13, %v1817_v54 }
 0x1e8   :  { %v767_v41 = vsel %vm107_vm0, %v759_v39, 0.0  ;;  %v764_v46 = vmul.f32 %v750_v45, %v1555_v22  ;;  %v766_v52 = vmul.f32 %v758_v49, %v1568_v31  ;;  %v1826_v6 = vsub.s32 6, %v1527_v2 }
 0x1e9   :  { %v770_v42 = vsel %vm107_vm0, %v760_v40, 0.0  ;;  %v776_v44 = vsel %vm107_vm0, %v762_v43, 0.0  ;;  %v923_v57 = vmul.f32 %v897_v55, %v1532_v5  ;;  %v925_v62 = vmul.f32 %v905_v60, %v1544_v13 }
 0x1ea   :  { %681 = vperm.xlu0 %1432, %v650_v24   ;;  %v551_v24 = vrot.slane %v519_v20, %v1730_v28  ;;  %v782_v47 = vsel %vm107_vm0, %v764_v46, 0.0  ;;  %v788_v53 = vsel %vm107_vm0, %v766_v52, 0.0  ;;  %v1060_v8 = vrot.slane %v1532_v5, %v1826_v6 }
 0x1eb   :  { %v933_v61 = vsel %vm107_vm0, %v923_v57, 0.0  ;;  %v939_v7 = vsel %vm107_vm0, %v925_v62, 0.0  ;;  %v1064_v12 = vrot.slane %v1539_v9, %v1826_v6  ;;  %v1837_v15 = vsub.s32 7, %v1527_v2 }
 0x1ec   :  { %v558_v0 = vsel %vm231_vm14, %v551_v24, %v557_v30  ;;  %v1086_v10 = vmul.f32 %v1060_v8, %v1532_v5  ;;  %v1068_v19 = vrot.slane %v1544_v13, %v1826_v6  ;;  %v1072_v2 = vrot.slane %v1550_v18, %v1826_v6 }
 0x1ed   :  { %v560_v33 = vsel %vm107_vm0, %v558_v0, 0.0  ;;  %v1087_v16 = vmul.f32 %v1064_v12, %v1539_v9  ;;  %v1223_v20 = vrot.slane %v1532_v5, %v1837_v15  ;;  %v921_v35 = vrot.slane %v1568_v31, %v1817_v54 }
 0x1ee   :  { %v1096_v11 = vsel %vm107_vm0, %v1086_v10, 0.0  ;;  %v1231_v3 = vrot.slane %v1544_v13, %v1837_v15  ;;  %v738_v46 = vrot.slane %v1539_v9, %v1794_v37  ;;  %v1235_v57 = vrot.slane %v1550_v18, %v1837_v15 }
 0x1ef   :  { %v1099_v59 = vsel %vm107_vm0, %v1087_v16, 0.0  ;;  %v1249_v23 = vmul.f32 %v1223_v20, %v1532_v5  ;;  %v1089_v5 = vmul.f32 %v1072_v2, %v1550_v18  ;;  %v1239_v10 = vrot.slane %v1555_v22, %v1837_v15 }
 0x1f0   :  { %v1251_v55 = vmul.f32 %v1231_v3, %v1544_v13  ;;  %v761_v62 = vmul.f32 %v738_v46, %v1539_v9  ;;  %v893_v2 = vrot.slane %v1530_v4, %v1817_v54 }
 0x1f1   :  { %v1105_v40 = vsel %vm107_vm0, %v1089_v5, 0.0  ;;  %v909_v5 = vrot.slane %v1550_v18, %v1817_v54 }
 0x206   :  { %235 = vadd.xlane.f32.xlu1 %v234_v21  ;;  %v1088_v21 = vmul.f32 %v1068_v19, %v1544_v13  ;;  %v1265_v13 = vsel %vm107_vm0, %v1251_v55, 0.0 }
 0x209   :  { %768 = vadd.xlane.f32.xlu0 %v767_v41 }
 0x20a   :  { %398 = vadd.xlane.f32.xlu1 %v397_v32  ;;  %v1102_v32 = vsel %vm107_vm0, %v1088_v21, 0.0 }
 0x20d   :  { %771 = vadd.xlane.f32.xlu0 %v770_v42  ;;  %v929_v42 = vmul.f32 %v921_v35, %v1568_v31 }
 0x20e   :  { %561 = vadd.xlane.f32.xlu1 %v560_v33 }
 0x211   :  { %777 = vadd.xlane.f32.xlu0 %v776_v44 }
 0x215   :  { %783 = vadd.xlane.f32.xlu0 %v782_v47 }
 0x219   :  { %789 = vadd.xlane.f32.xlu0 %v788_v53  ;;  %v951_v53 = vsel %vm107_vm0, %v929_v42, 0.0  ;;  %v917_v42 = vrot.slane %v1560_v26, %v1817_v54 }
 0x21b   :  { %v928_v3 = vmul.f32 %v917_v42, %v1560_v26 }
 0x21d   :  { %934 = vadd.xlane.f32.xlu0 %v933_v61 }
 0x21f   :  { %672 = vperm.xlu1 %1433, %v647_v34   ;;  %v1259_v34 = vsel %vm107_vm0, %v1249_v23, 0.0  ;;  %v792_v23 = vsel %vm791_vm15, 1.0, %v1492_v58 }
 0x221   :  { %940 = vadd.xlane.f32.xlu0 %v939_v7  ;;  %v746_v7 = vrot.slane %v1550_v18, %v1794_v37 }
 0x223   :  { %678 = vperm.xlu1 %1433, %v649_v36   ;;  %v763_v12 = vmul.f32 %v746_v7, %v1550_v18 }
 0x225   :  { %1097 = vadd.xlane.f32.xlu0 %v1096_v11  ;;  %v773_v11 = vsel %vm107_vm0, %v761_v62, 0.0  ;;  %v779_v19 = vsel %vm107_vm0, %v763_v12, 0.0 }
 0x229   :  { %1100 = vadd.xlane.f32.xlu0 %v1099_v59  ;;  %v1247_v59 = vrot.slane %v1568_v31, %v1837_v15 }
 0x22d   :  { %1103 = vadd.xlane.f32.xlu0 %v1102_v32 }
 0x231   :  { %1260 = vadd.xlane.f32.xlu0 %v1259_v34 }
 0x235   :  { %1106 = vadd.xlane.f32.xlu0 %v1105_v40 }
 0x239   :  { %952 = vadd.xlane.f32.xlu0 %v951_v53  ;;  %v1080_v53 = vrot.slane %v1560_v26, %v1826_v6 }
 0x23d   :  { %1266 = vadd.xlane.f32.xlu0 %v1265_v13 }
 0x25d   :  { %v664_v48 = vpop.permute.xlu1 %663  ;;  %v661_v50 = vpop.permute.xlu0 %660 }
 0x25e   :  { %v690_v24 = vrot.slane %v664_v48, %v1730_v28  ;;  %v686_v29 = vrot.slane %v661_v50, %v1730_v28  ;;  %v1252_v50 = vmul.f32 %v1235_v57, %v1550_v18  ;;  %v1439_v57 = vld [vmem:[#allocation4 + $0x30] sm:$0xff] }
 0x25f   :  { %v1243_v62 = vrot.slane %v1439_v57, %v1837_v15 }
 0x260   :  { %v715_v36 = vsel %vm219_vm8, %v690_v24, %v686_v29  ;;  %v1268_v16 = vsel %vm107_vm0, %v1252_v50, 0.0  ;;  %v922_v24 = vmul.f32 %v893_v2, %v1530_v4  ;;  %v901_v29 = vrot.slane %v1539_v9, %v1817_v54 }
 0x261   :  { %v667_v56 = vpop.permute.xlu1 %666  ;;  %v670_v17 = vpop.permute.xlu0 %669  ;;  %1269 = vadd.xlane.f32.xlu0 %v1268_v16  ;;  %v1118_v2 = vsel %vm1117_vm3, 1.0, %v1492_v58 }
 0x262   :  { %v694_v30 = vrot.slane %v667_v56, %v1730_v28  ;;  %v698_v38 = vrot.slane %v670_v17, %v1730_v28  ;;  %v1253_v17 = vmul.f32 %v1239_v10, %v1555_v22  ;;  %v924_v32 = vmul.f32 %v901_v29, %v1539_v9 }
 0x264   :  { %v716_v39 = vsel %vm221_vm9, %v694_v30, %v715_v36  ;;  %v930_v30 = vsel %vm107_vm0, %v922_v24, 0.0  ;;  %v926_v36 = vmul.f32 %v909_v5, %v1550_v18 }
 0x265   :  { %v676_v33 = vpop.permute.xlu0 %675  ;;  %v717_v43 = vsel %vm223_vm10, %v698_v38, %v716_v39  ;;  %v913_v38 = vrot.slane %v1555_v22, %v1817_v54 }
 0x266   :  { %v706_v47 = vrot.slane %v676_v33, %v1730_v28  ;;  %v936_v33 = vsel %vm107_vm0, %v924_v32, 0.0  ;;  %v942_v9 = vsel %vm107_vm0, %v926_v36, 0.0 }
 0x267   :  { %v927_v39 = vmul.f32 %v913_v38, %v1555_v22 }
 0x269   :  { %v682_v44 = vpop.permute.xlu0 %681 }
 0x26a   :  { %v714_v48 = vrot.slane %v682_v44, %v1730_v28 }
 0x293   :  { %v236_v14 = vpop.xlane.xlu1 %235 }
 0x297   :  { %v399_v63 = vpop.xlane.xlu1 %398 }
 0x298   :  { %v400_v1 = vadd.f32 %v399_v63, %v236_v14  ;;  %v754_v14 = vrot.slane %v1560_v26, %v1794_v37  ;;  %v1271_v63 = vsel %vm107_vm0, %v1253_v17, 0.0 }
 0x299   :  { %1272 = vadd.xlane.f32.xlu0 %v1271_v63 }
 0x29a   :  { %v765_v20 = vmul.f32 %v754_v14, %v1560_v26 }
 0x29b   :  { %v562_v0 = vpop.xlane.xlu1 %561 }
 0x29c   :  { %v1853_v27 = vadd.f32 %v562_v0, %v400_v1  ;;  %v1255_v1 = vmul.f32 %v1247_v59, %v1568_v31  ;;  %v785_v37 = vsel %vm107_vm0, %v765_v20, 0.0  ;;  %v1056_v0 = vrot.slane %v1530_v4, %v1826_v6 }
 0x29e   :  { %v1277_v21 = vsel %vm107_vm0, %v1255_v1, 0.0  ;;  %v1085_v34 = vmul.f32 %v1056_v0, %v1530_v4  ;;  %v945_v4 = vsel %vm107_vm0, %v927_v39, 0.0 }
 0x29f   :  { %v673_v25 = vpop.permute.xlu1 %672  ;;  %1278 = vadd.xlane.f32.xlu0 %v1277_v21 }
 0x2a0   :  { %v702_v41 = vrot.slane %v673_v25, %v1730_v28  ;;  %v1093_v35 = vsel %vm107_vm0, %v1085_v34, 0.0  ;;  %v1436_v25 = vld [vmem:[#allocation4] sm:$0xff] }
 0x2a2   :  { %v718_v45 = vsel %vm225_vm11, %v702_v41, %v717_v43  ;;  %v1219_v41 = vrot.slane %v1436_v25, %v1837_v15  ;;  %v1437_v43 = vld [vmem:[#allocation4 + $0x10] sm:$0xff] }
 0x2a3   :  { %v679_v49 = vpop.permute.xlu1 %678  ;;  %v719_v61 = vsel %vm227_vm12, %v706_v47, %v718_v45  ;;  %v1227_v44 = vrot.slane %v1437_v43, %v1837_v15  ;;  %v948_v45 = vsel %vm107_vm0, %v928_v3, 0.0  ;;  %v1076_v47 = vrot.slane %v1555_v22, %v1826_v6 }
 0x2a4   :  { %v710_v52 = vrot.slane %v679_v49, %v1730_v28  ;;  %v1248_v40 = vmul.f32 %v1436_v25, %v1219_v41 }
 0x2a5   :  { %v1250_v46 = vmul.f32 %v1437_v43, %v1227_v44 }
 0x2a6   :  { %v720_v60 = vsel %vm229_vm13, %v710_v52, %v719_v61  ;;  %v1256_v18 = vsel %vm107_vm0, %v1248_v40, 0.0  ;;  %v1438_v52 = vld [vmem:[#allocation4 + $0x28] sm:$0xff]  ;;  %v1084_v61 = vrot.slane %v1568_v31, %v1826_v6  ;;  %v1281_v6 = vsel %vm1280_vm2, 1.0, %v1492_v58 }
 0x2a7   :  { %v721_v8 = vsel %vm231_vm14, %v714_v48, %v720_v60  ;;  %v1262_v49 = vsel %vm107_vm0, %v1250_v46, 0.0  ;;  %v1090_v54 = vmul.f32 %v1438_v52, %v1076_v47  ;;  %v1091_v48 = vmul.f32 %v1439_v57, %v1080_v53 }
 0x2a8   :  { %v723_v56 = vsel %vm107_vm0, %v721_v8, 0.0  ;;  %v1092_v22 = vmul.f32 %v1084_v61, %v1568_v31  ;;  %v1254_v8 = vmul.f32 %v1439_v57, %v1243_v62  ;;  %v769_v31 = vpop.xlane.xlu0 %768 }
 0x2a9   :  { %724 = vadd.xlane.f32.xlu1 %v723_v56  ;;  %v1108_v55 = vsel %vm107_vm0, %v1090_v54, 0.0  ;;  %v1111_v60 = vsel %vm107_vm0, %v1091_v48, 0.0  ;;  %v955_v56 = vsel %vm954_vm1, 1.0, %v1492_v58 }
 0x2aa   :  { %v1114_v7 = vsel %vm107_vm0, %v1092_v22, 0.0  ;;  %v1274_v26 = vsel %vm107_vm0, %v1254_v8, 0.0 }
 0x2ac   :  { %v772_v15 = vpop.xlane.xlu0 %771 }
 0x2ad   :  { %774 = vadd.xlane.f32.xlu1 %v773_v11 }
 0x2b0   :  { %v778_v10 = vpop.xlane.xlu0 %777 }
 0x2b1   :  { %780 = vadd.xlane.f32.xlu1 %v779_v19 }
 0x2b4   :  { %v784_v14 = vpop.xlane.xlu0 %783 }
 0x2b5   :  { %786 = vadd.xlane.f32.xlu1 %v785_v37 }
 0x2b8   :  { %v790_v17 = vpop.xlane.xlu0 %789 }
 0x2bc   :  { %v935_v5 = vpop.xlane.xlu0 %934 }
 0x2c0   :  { %v941_v36 = vpop.xlane.xlu0 %940 }
 0x2c6   :  { %795 = vbcast.lane.b32.xlu1 %v792_v23, 256 }
 0x2ea   :  { %931 = vadd.xlane.f32.xlu1 %v930_v30 }
 0x2ee   :  { %937 = vadd.xlane.f32.xlu1 %v936_v33 }
 0x2f2   :  { %1094 = vadd.xlane.f32.xlu1 %v1093_v35 }
 0x2f6   :  { %943 = vadd.xlane.f32.xlu1 %v942_v9  ;;  %v1098_v9 = vpop.xlane.xlu0 %1097 }
 0x2fa   :  { %946 = vadd.xlane.f32.xlu1 %v945_v4  ;;  %v1101_v58 = vpop.xlane.xlu0 %1100 }
 0x2fe   :  { %1257 = vadd.xlane.f32.xlu1 %v1256_v18  ;;  %v1104_v4 = vpop.xlane.xlu0 %1103 }
 0x302   :  { %949 = vadd.xlane.f32.xlu1 %v948_v45  ;;  %v1261_v42 = vpop.xlane.xlu0 %1260 }
 0x306   :  { %1263 = vadd.xlane.f32.xlu1 %v1262_v49  ;;  %v1107_v45 = vpop.xlane.xlu0 %1106 }
 0x30a   :  { %1109 = vadd.xlane.f32.xlu1 %v1108_v55  ;;  %v953_v53 = vpop.xlane.xlu0 %952 }
 0x30e   :  { %1112 = vadd.xlane.f32.xlu1 %v1111_v60  ;;  %v1267_v60 = vpop.xlane.xlu0 %1266 }
 0x312   :  { %1115 = vadd.xlane.f32.xlu1 %v1114_v7  ;;  %v1270_v22 = vpop.xlane.xlu0 %1269 }
 0x316   :  { %1275 = vadd.xlane.f32.xlu1 %v1274_v26 }
 0x326   :  { %v1273_v62 = vpop.xlane.xlu0 %1272 }
 0x327   :  { %958 = vbcast.lane.b32.xlu1 %v955_v56, 256 }
 0x32b   :  { %1284 = vbcast.lane.b32.xlu1 %v1281_v6, 256 }
 0x32c   :  { %v1279_v7 = vpop.xlane.xlu0 %1278 }
 0x336   :  { %v725_v13 = vpop.xlane.xlu1 %724 }
 0x337   :  { %v1950_v50 = vadd.f32 %v725_v13, %v1853_v27 }
 0x33a   :  { %v775_v11 = vpop.xlane.xlu1 %774 }
 0x33e   :  { %v781_v12 = vpop.xlane.xlu1 %780 }
 0x342   :  { %v787_v16 = vpop.xlane.xlu1 %786 }
 0x346   :  { %v796_v59 = vpop.permute.xlu1 %795 }
 0x347   :  { %v1952_v19 = vsub.f32 %v790_v17, %v796_v59  ;;  %v798_v20 = vsub.f32 %v769_v31, %v796_v59  ;;  %v799_v63 = vsub.f32 %v772_v15, %v796_v59  ;;  %v802_v1 = vsub.f32 %v781_v12, %v796_v59 }
 0x348   :  { %v1954_v37 = vsub.f32 %v787_v16, %v796_v59  ;;  %v801_v27 = vsub.f32 %v778_v10, %v796_v59  ;;  %v800_v29 = vsub.f32 %v775_v11, %v796_v59  ;;  %v803_v55 = vsub.f32 %v784_v14, %v796_v59 }
 0x349   :  { %v806_v21 = vmul.f32 %v798_v20, %v798_v20  ;;  %v807_v23 = vmul.f32 %v799_v63, %v799_v63  ;;  %v810_v52 = vmul.f32 %v802_v1, %v802_v1  ;;  %v813_v14 = vmul.f32 %v1952_v19, %v1952_v19 }
 0x34a   :  { %v809_v24 = vmul.f32 %v801_v27, %v801_v27  ;;  %v808_v30 = vmul.f32 %v800_v29, %v800_v29  ;;  %v811_v48 = vmul.f32 %v803_v55, %v803_v55  ;;  %v812_v11 = vmul.f32 %v1954_v37, %v1954_v37 }
 0x34b   :  { %823 = vperm.xlu0 %1432, %v806_v21   ;;  %826 = vperm.xlu1 %1433, %v807_v23  }
 0x34f   :  { %1121 = vbcast.lane.b32.xlu0 %v1118_v2, 256  ;;  %832 = vperm.xlu1 %1433, %v809_v24  }
 0x353   :  { %829 = vperm.xlu0 %1432, %v808_v30  }
 0x377   :  { %v932_v32 = vpop.xlane.xlu1 %931 }
 0x37b   :  { %v938_v0 = vpop.xlane.xlu1 %937 }
 0x37f   :  { %v1095_v33 = vpop.xlane.xlu1 %1094 }
 0x383   :  { %v944_v34 = vpop.xlane.xlu1 %943 }
 0x387   :  { %v947_v35 = vpop.xlane.xlu1 %946 }
 0x38b   :  { %v1258_v38 = vpop.xlane.xlu1 %1257 }
 0x38f   :  { %v1958_v51 = vpop.xlane.xlu1 %949 }
 0x393   :  { %v1960_v39 = vpop.xlane.xlu1 %1263 }
 0x397   :  { %v1962_v25 = vpop.xlane.xlu1 %1109 }
 0x39b   :  { %v1964_v41 = vpop.xlane.xlu1 %1112 }
 0x39f   :  { %v1966_v40 = vpop.xlane.xlu1 %1115 }
 0x3a3   :  { %v1968_v18 = vpop.xlane.xlu1 %1275 }
 0x3a7   :  { %v959_v3 = vpop.permute.xlu1 %958 }
 0x3a8   :  { %v961_v43 = vsub.f32 %v932_v32, %v959_v3  ;;  %v962_v44 = vsub.f32 %v935_v5, %v959_v3  ;;  %v963_v49 = vsub.f32 %v938_v0, %v959_v3  ;;  %v964_v57 = vsub.f32 %v941_v36, %v959_v3 }
 0x3a9   :  { %v965_v13 = vsub.f32 %v944_v34, %v959_v3  ;;  %v966_v59 = vsub.f32 %v947_v35, %v959_v3  ;;  %v967_v24 = vsub.f32 %v1958_v51, %v959_v3  ;;  %v968_v19 = vsub.f32 %v953_v53, %v959_v3 }
 0x3aa   :  { %v969_v46 = vmul.f32 %v961_v43, %v961_v43  ;;  %v970_v47 = vmul.f32 %v962_v44, %v962_v44  ;;  %v971_v54 = vmul.f32 %v963_v49, %v963_v49  ;;  %v972_v61 = vmul.f32 %v964_v57, %v964_v57 }
 0x3ab   :  { %v973_v10 = vmul.f32 %v965_v13, %v965_v13  ;;  %v1285_v20 = vpop.permute.xlu1 %1284  ;;  %v974_v1 = vmul.f32 %v966_v59, %v966_v59  ;;  %v975_v30 = vmul.f32 %v967_v24, %v967_v24  ;;  %v976_v0 = vmul.f32 %v968_v19, %v968_v19 }
 0x3ac   :  { %986 = vperm.xlu0 %1432, %v969_v46   ;;  %989 = vperm.xlu1 %1433, %v970_v47   ;;  %v1288_v21 = vsub.f32 %v1261_v42, %v1285_v20  ;;  %v1287_v23 = vsub.f32 %v1258_v38, %v1285_v20  ;;  %v1289_v32 = vsub.f32 %v1960_v39, %v1285_v20 }
 0x3ad   :  { %v1291_v36 = vsub.f32 %v1270_v22, %v1285_v20  ;;  %v1294_v3 = vsub.f32 %v1279_v7, %v1285_v20 }
 0x3ae   :  { %v1296_v27 = vmul.f32 %v1288_v21, %v1288_v21  ;;  %v1295_v37 = vmul.f32 %v1287_v23, %v1287_v23  ;;  %v1297_v34 = vmul.f32 %v1289_v32, %v1289_v32 }
 0x3af   :  { %v1302_v44 = vmul.f32 %v1294_v3, %v1294_v3 }
 0x3b0   :  { %835 = vperm.xlu0 %1432, %v810_v52   ;;  %992 = vperm.xlu1 %1433, %v971_v54  }
 0x3b4   :  { %838 = vperm.xlu0 %1432, %v811_v48   ;;  %995 = vperm.xlu1 %1433, %v972_v61  }
 0x3ca   :  { %v1970_v8 = vpop.permute.xlu0 %823 }
 0x3ce   :  { %v1122_v26 = vpop.permute.xlu0 %1121 }
 0x3cf   :  { %v1125_v56 = vsub.f32 %v1098_v9, %v1122_v26  ;;  %v1124_v6 = vsub.f32 %v1095_v33, %v1122_v26  ;;  %v1126_v12 = vsub.f32 %v1101_v58, %v1122_v26  ;;  %v1127_v17 = vsub.f32 %v1104_v4, %v1122_v26 }
 0x3d0   :  { %v1128_v2 = vsub.f32 %v1107_v45, %v1122_v26  ;;  %v1290_v33 = vsub.f32 %v1267_v60, %v1285_v20  ;;  %v1129_v5 = vsub.f32 %v1962_v25, %v1122_v26  ;;  %v1130_v51 = vsub.f32 %v1964_v41, %v1122_v26  ;;  %v827_v41 = vpop.permute.xlu1 %826 }
 0x3d1   :  { %v1133_v31 = vmul.f32 %v1125_v56, %v1125_v56  ;;  %v1132_v15 = vmul.f32 %v1124_v6, %v1124_v6  ;;  %v1134_v16 = vmul.f32 %v1126_v12, %v1126_v12  ;;  %v1135_v63 = vmul.f32 %v1127_v17, %v1127_v17 }
 0x3d2   :  { %v1136_v29 = vmul.f32 %v1128_v2, %v1128_v2  ;;  %v1298_v35 = vmul.f32 %v1290_v33, %v1290_v33  ;;  %v1137_v38 = vmul.f32 %v1129_v5, %v1129_v5  ;;  %v1299_v9 = vmul.f32 %v1291_v36, %v1291_v36  ;;  %v830_v47 = vpop.permute.xlu0 %829 }
 0x3d3   :  { %1152 = vperm.xlu1 %1433, %v1133_v31   ;;  %1149 = vperm.xlu0 %1432, %v1132_v15   ;;  %v1292_v58 = vsub.f32 %v1273_v62, %v1285_v20  ;;  %v1138_v4 = vmul.f32 %v1130_v51, %v1130_v51  ;;  %v1131_v39 = vsub.f32 %v1966_v40, %v1122_v26 }
 0x3d4   :  { %v1293_v25 = vsub.f32 %v1968_v18, %v1285_v20  ;;  %v833_v46 = vpop.permute.xlu1 %832  ;;  %v853_v57 = vrot.slane %v827_v41, %v1730_v28  ;;  %v849_v18 = vrot.slane %v1970_v8, %v1730_v28  ;;  %v857_v48 = vrot.slane %v830_v47, %v1730_v28 }
 0x3d5   :  { %v1300_v42 = vmul.f32 %v1292_v58, %v1292_v58  ;;  %v1139_v43 = vmul.f32 %v1131_v39, %v1131_v39  ;;  %v861_v6 = vrot.slane %v833_v46, %v1730_v28 }
 0x3d6   :  { %v1301_v45 = vmul.f32 %v1293_v25, %v1293_v25  ;;  %v878_v22 = vsel %vm219_vm8, %v853_v57, %v849_v18 }
 0x3d7   :  { %998 = vperm.xlu1 %1433, %v973_v10   ;;  %841 = vperm.xlu0 %1432, %v812_v11   ;;  %v879_v62 = vsel %vm221_vm9, %v857_v48, %v878_v22 }
 0x3d8   :  { %v880_v8 = vsel %vm223_vm10, %v861_v6, %v879_v62 }
 0x3db   :  { %844 = vperm.xlu1 %1433, %v813_v14   ;;  %1155 = vperm.xlu0 %1432, %v1134_v16  }
 0x3df   :  { %1158 = vperm.xlu1 %1433, %v1135_v63   ;;  %1001 = vperm.xlu0 %1432, %v974_v1  }
 0x3e3   :  { %1315 = vperm.xlu1 %1433, %v1296_v27   ;;  %1312 = vperm.xlu0 %1432, %v1295_v37  }
 0x3e7   :  { %1161 = vperm.xlu1 %1433, %v1136_v29   ;;  %1004 = vperm.xlu0 %1432, %v975_v30  }
 0x3eb   :  { %1007 = vperm.xlu1 %1433, %v976_v0   ;;  %1318 = vperm.xlu0 %1432, %v1297_v34  }
 0x3ef   :  { %1321 = vperm.xlu1 %1433, %v1298_v35   ;;  %1164 = vperm.xlu0 %1432, %v1137_v38  }
 0x3f3   :  { %1324 = vperm.xlu1 %1433, %v1299_v9   ;;  %1167 = vperm.xlu0 %1432, %v1138_v4  }
 0x3f7   :  { %1327 = vperm.xlu1 %1433, %v1300_v42   ;;  %1170 = vperm.xlu0 %1432, %v1139_v43  }
 0x3fb   :  { %1333 = vperm.xlu1 %1433, %v1302_v44   ;;  %1330 = vperm.xlu0 %1432, %v1301_v45  }
 0x42b   :  { %v990_v49 = vpop.permute.xlu1 %989  ;;  %v987_v52 = vpop.permute.xlu0 %986 }
 0x42c   :  { %v1016_v23 = vrot.slane %v990_v49, %v1730_v28  ;;  %v1012_v27 = vrot.slane %v987_v52, %v1730_v28 }
 0x42e   :  { %v1041_v30 = vsel %vm219_vm8, %v1016_v23, %v1012_v27 }
 0x42f   :  { %v993_v54 = vpop.permute.xlu1 %992  ;;  %v836_v40 = vpop.permute.xlu0 %835 }
 0x430   :  { %v865_v7 = vrot.slane %v836_v40, %v1730_v28  ;;  %v1020_v37 = vrot.slane %v993_v54, %v1730_v28 }
 0x432   :  { %v881_v13 = vsel %vm225_vm11, %v865_v7, %v880_v8  ;;  %v1042_v0 = vsel %vm221_vm9, %v1020_v37, %v1041_v30 }
 0x433   :  { %v996_v53 = vpop.permute.xlu1 %995  ;;  %v839_v55 = vpop.permute.xlu0 %838 }
 0x434   :  { %v869_v31 = vrot.slane %v839_v55, %v1730_v28  ;;  %v1024_v2 = vrot.slane %v996_v53, %v1730_v28 }
 0x436   :  { %v882_v12 = vsel %vm227_vm12, %v869_v31, %v881_v13  ;;  %v1043_v34 = vsel %vm223_vm10, %v1024_v2, %v1042_v0 }
 0x452   :  { %v1153_v61 = vpop.permute.xlu1 %1152  ;;  %v1150_v60 = vpop.permute.xlu0 %1149 }
 0x453   :  { %v1179_v3 = vrot.slane %v1153_v61, %v1730_v28  ;;  %v1175_v43 = vrot.slane %v1150_v60, %v1730_v28 }
 0x455   :  { %v1204_v47 = vsel %vm219_vm8, %v1179_v3, %v1175_v43 }
 0x456   :  { %v999_v26 = vpop.permute.xlu1 %998  ;;  %v842_v56 = vpop.permute.xlu0 %841 }
 0x457   :  { %v873_v15 = vrot.slane %v842_v56, %v1730_v28  ;;  %v1028_v24 = vrot.slane %v999_v26, %v1730_v28 }
 0x459   :  { %v883_v16 = vsel %vm229_vm13, %v873_v15, %v882_v12  ;;  %v1044_v5 = vsel %vm225_vm11, %v1028_v24, %v1043_v34 }
 0x45a   :  { %v845_v10 = vpop.permute.xlu1 %844  ;;  %v1156_v11 = vpop.permute.xlu0 %1155 }
 0x45b   :  { %v877_v14 = vrot.slane %v845_v10, %v1730_v28  ;;  %v1183_v25 = vrot.slane %v1156_v11, %v1730_v28 }
 0x45d   :  { %v884_v17 = vsel %vm231_vm14, %v877_v14, %v883_v16  ;;  %v1205_v52 = vsel %vm221_vm9, %v1183_v25, %v1204_v47 }
 0x45e   :  { %v1159_v59 = vpop.permute.xlu1 %1158  ;;  %v1002_v20 = vpop.permute.xlu0 %1001  ;;  %v886_v63 = vsel %vm107_vm0, %v884_v17, 0.0 }
 0x45f   :  { %887 = vadd.xlane.f32.xlu0 %v886_v63  ;;  %v1032_v32 = vrot.slane %v1002_v20, %v1730_v28  ;;  %v1187_v44 = vrot.slane %v1159_v59, %v1730_v28 }
 0x461   :  { %v1045_v38 = vsel %vm227_vm12, %v1032_v32, %v1044_v5  ;;  %v1206_v55 = vsel %vm223_vm10, %v1187_v44, %v1205_v52  ;;  %v1391_v32 = vld [vmem:[#allocation3] sm:$0xff]  ;;  %v1397_v5 = vld [vmem:[#allocation2] sm:$0xff] }
 0x462   :  { %v1316_v1 = vpop.permute.xlu1 %1315  ;;  %v1313_v21 = vpop.permute.xlu0 %1312 }
 0x463   :  { %v1342_v54 = vrot.slane %v1316_v1, %v1730_v28  ;;  %v1338_v40 = vrot.slane %v1313_v21, %v1730_v28 }
 0x465   :  { %v1367_v26 = vsel %vm219_vm8, %v1342_v54, %v1338_v40 }
 0x466   :  { %v1162_v19 = vpop.permute.xlu1 %1161  ;;  %v1005_v29 = vpop.permute.xlu0 %1004 }
 0x467   :  { %v1036_v33 = vrot.slane %v1005_v29, %v1730_v28  ;;  %v1191_v45 = vrot.slane %v1162_v19, %v1730_v28 }
 0x469   :  { %v1046_v9 = vsel %vm229_vm13, %v1036_v33, %v1045_v38  ;;  %v1207_v18 = vsel %vm225_vm11, %v1191_v45, %v1206_v55 }
 0x46a   :  { %v1008_v35 = vpop.permute.xlu1 %1007  ;;  %v1319_v36 = vpop.permute.xlu0 %1318 }
 0x46b   :  { %v1040_v51 = vrot.slane %v1008_v35, %v1730_v28  ;;  %v1346_v57 = vrot.slane %v1319_v36, %v1730_v28 }
 0x46d   :  { %v1047_v58 = vsel %vm231_vm14, %v1040_v51, %v1046_v9  ;;  %v1368_v31 = vsel %vm221_vm9, %v1346_v57, %v1367_v26 }
 0x46e   :  { %v1322_v4 = vpop.permute.xlu1 %1321  ;;  %v1165_v39 = vpop.permute.xlu0 %1164  ;;  %v1049_v42 = vsel %vm107_vm0, %v1047_v58, 0.0 }
 0x46f   :  { %1050 = vadd.xlane.f32.xlu1 %v1049_v42  ;;  %v1195_v49 = vrot.slane %v1165_v39, %v1730_v28  ;;  %v1350_v48 = vrot.slane %v1322_v4, %v1730_v28 }
 0x471   :  { %v1208_v22 = vsel %vm227_vm12, %v1195_v49, %v1207_v18  ;;  %v1369_v8 = vsel %vm223_vm10, %v1350_v48, %v1368_v31 }
 0x472   :  { %v1325_v41 = vpop.permute.xlu1 %1324  ;;  %v1168_v46 = vpop.permute.xlu0 %1167 }
 0x473   :  { %v1199_v53 = vrot.slane %v1168_v46, %v1730_v28  ;;  %v1354_v62 = vrot.slane %v1325_v41, %v1730_v28 }
 0x475   :  { %v1209_v6 = vsel %vm229_vm13, %v1199_v53, %v1208_v22  ;;  %v1370_v12 = vsel %vm225_vm11, %v1354_v62, %v1369_v8 }
 0x476   :  { %v1328_v61 = vpop.permute.xlu1 %1327  ;;  %v1171_v60 = vpop.permute.xlu0 %1170 }
 0x477   :  { %v1203_v7 = vrot.slane %v1171_v60, %v1730_v28  ;;  %v1358_v56 = vrot.slane %v1328_v61, %v1730_v28 }
 0x479   :  { %v1210_v15 = vsel %vm231_vm14, %v1203_v7, %v1209_v6  ;;  %v1371_v17 = vsel %vm227_vm12, %v1358_v56, %v1370_v12 }
 0x47a   :  { %v1334_v13 = vpop.permute.xlu1 %1333  ;;  %v1331_v10 = vpop.permute.xlu0 %1330  ;;  %v1212_v11 = vsel %vm107_vm0, %v1210_v15, 0.0 }
 0x47b   :  { %v1366_v14 = vrot.slane %v1334_v13, %v1730_v28  ;;  %v1362_v16 = vrot.slane %v1331_v10, %v1730_v28  ;;  %1213 = vadd.xlane.f32.xlu0 %v1212_v11 }
 0x47d   :  { %v1372_v59 = vsel %vm229_vm13, %v1362_v16, %v1371_v17 }
 0x47e   :  { %v1373_v20 = vsel %vm231_vm14, %v1366_v14, %v1372_v59 }
 0x47f   :  { %v1375_v63 = vsel %vm107_vm0, %v1373_v20, 0.0  ;;  %vm1409_vm0 = vcmask 0  }
 0x480   :  { %1376 = vadd.xlane.f32.xlu0 %v1375_v63 }
 0x4ec   :  { %v888_v1 = vpop.xlane.xlu0 %887 }
 0x4ed   :  { %v889_v23 = vadd.f32 %v888_v1, %v1950_v50  ;;  %v1398_v50 = vmul.f32 0.125, %v1397_v5 }
 0x4fc   :  { %v1051_v21 = vpop.xlane.xlu1 %1050 }
 0x4fd   :  { %v1052_v37 = vadd.f32 %v1051_v21, %v889_v23 }
 0x508   :  { %v1214_v27 = vpop.xlane.xlu0 %1213 }
 0x509   :  { %v1215_v2 = vadd.f32 %v1214_v27, %v1052_v37 }
 0x50d   :  { %v1377_v24 = vpop.xlane.xlu0 %1376 }
 0x50e   :  { %v1378_v19 = vadd.f32 %v1377_v24, %v1215_v2 }
 0x510   :  { %1434 = vrsqrt.f32 %v1378_v19  ;;  %vm1381_vm4 = vcmp.eq.f32.partialorder %v1378_v19, inf  ;;  %v1384_v30 = vand.u32 2147483648, %v1378_v19  ;;  %vm1383_vm6 = vcmp.eq.f32.partialorder %v1378_v19, 0.0 }
 0x51a   :  { %v1435_v28 = vpop.eup %1434 }
 0x51b   :  { %v1380_v29 = vmul.f32 %v1435_v28, %v1378_v19 }
 0x51d   :  { %v1382_v0 = vsel %vm1381_vm4, %v1378_v19, %v1380_v29 }
 0x51e   :  { %v1385_v33 = vsel %vm1383_vm6, %v1384_v30, %v1382_v0 }
 0x51f   :  { %v1392_v34 = vadd.f32 %v1391_v32, %v1385_v33 }
 0x521   :  { %1393 = vst.msk [vmem:[#allocation3] sm:$0xff] %vm33_vm5, %v1392_v34 }
 0x528   :  { %v1399_v35 = vld [vmem:[#allocation3] sm:$0xff] }
 0x529   :  { %v1400_v36 = vmul.f32 0.000125, %v1399_v35 }
 0x52b   :  { %v1401_v38 = vadd.f32 %v1400_v36, %v1398_v50 }
 0x52d   :  { %v1402_v51 = vsel %vm33_vm5, %v1401_v38, 0.0 }
 0x52e   :  { %v1403_v9 = vrot.slane %v1402_v51, 4 }
 0x530   :  { %v1404_v58 = vadd.f32 %v1403_v9, %v1402_v51 }
 0x532   :  { %v1405_v4 = vrot.slane %v1404_v58, 2 }
 0x534   :  { %v1406_v39 = vadd.f32 %v1405_v4, %v1404_v58 }
 0x536   :  { %v1407_v42 = vrot.slane %v1406_v39, 1 }
 0x538   :  { %v1408_v3 = vadd.f32 %v1407_v42, %v1406_v39 }
 0x53a   :  { %1410 = vst.msk [vmem:[#allocation7] sm:$0x1] %vm1409_vm0, %v1408_v3 }
 0x53b   :  { %1473 = shalt.err (!%p1470_p12)
}
 0x53c   :  { %s1474_s6 = scalar_lea.hbm %s2065_s3, 16 }
 0x53d   :  { %p1475_p13 = scmp.ne.s32.totalorder %s2065_s3, %s1474_s6  ;;  %p1478_p0 = scmp.lt.u32.totalorder %s1474_s6, %s2065_s3 }
 0x53f   :  { %p1480_p1 = pnand %p1478_p0, %p1475_p13 }
 0x541   :  { %1483 = shalt.err (!%p1480_p1)
}
 0x542   :  { %1420 = dma.vmem_to_hbm [thread:$0]  %s1418_s28, 16, %s2065_s3, [#allocation6]  }
 0x543   :  { %1486 = dma.done.wait [#allocation6], 16  }
 0x544   :  { %1487 = vsyncadd [#allocation6], 4294967280 }
 0x545   :  { %1424 = vsyncpa [#allocation5], 1 }
 0x546   :  { %1425 = vsyncpa [#allocation6], 1 }

</bundles_post_ra>
